<compile_context>
chip_gen: v5e
topology: v5e:2x2
jax: 0.10.0
libtpu: 0.0.40
codegen_flags: <defaults>
</compile_context>

<pallas_src>
import functools

import jax
import jax.numpy as jnp
from jax import lax
from jax.experimental import pallas as pl
from jax.experimental.pallas import tpu as pltpu


# dot_general dimension numbers for 2-D operands (only "standard" and
# "rhs-transposed" contractions are used -- both are first-class on the MXU).
_DN_RT = (((1,), (1,)), ((), ()))   # A[M,K] . B[N,K] -> [M,N]   (a @ b.T)


def _gelu(x):
    # tanh-approximate GELU (EUP-friendly); torch default is exact erf,
    # difference is <= 3e-3 per activation.
    c = 0.7978845608028654  # sqrt(2/pi)
    return 0.5 * x * (1.0 + jnp.tanh(c * (x + 0.044715 * x * x * x)))


def _round_up(x, m):
    return ((x + m - 1) // m) * m


def _pinned(shape):
    nd = len(shape)
    return pl.BlockSpec(shape, lambda b, t, _nd=nd: (0,) * _nd)


# --------------------------------------------------------------------------- #
# Pass 1: per-superpoint statistics + relation MLP -> superpoint features
# --------------------------------------------------------------------------- #
def _stats_mlp_kernel(coords_ref, labels_ref,
                      w1_ref, b1_ref, w2_ref, b2_ref,
                      w3_ref, b3_ref, g_ref, be_ref, w4_ref, b4_ref,
                      out_ref, acc_ref, *, s_max, transpose_out):
    f32 = jnp.float32
    S = s_max
    NT = coords_ref.shape[2]
    t = pl.program_id(1)

    @pl.when(t == 0)
    def _init():
        acc_ref[...] = jnp.zeros_like(acc_ref)

    # ---- accumulate per-superpoint coordinate sums and counts over this tile
    coords = coords_ref[0].astype(f32)                             # [3, NT]
    labels = labels_ref[0]                                         # [1, NT]
    sp_ids = lax.broadcasted_iota(jnp.int32, (S, NT), 0)
    onehot = (labels == sp_ids).astype(f32)                        # [S, NT]
    sums = lax.dot_general(onehot, coords, _DN_RT,
                           preferred_element_type=f32)             # [S, 3]
    counts = jnp.sum(onehot, axis=1, keepdims=True)                # [S, 1]
    acc_ref[:, 0:3] += sums
    acc_ref[:, 3:4] += counts

    # ---- finalize on the last point tile ------------------------------------
    @pl.when(t == pl.num_programs(1) - 1)
    def _finalize():
        sums_all = acc_ref[:, 0:3]                                 # [S, 3]
        counts_all = acc_ref[:, 3:4]                               # [S, 1]
        centers = sums_all / jnp.maximum(counts_all, 1.0)          # [S, 3]
        valid_col = (counts_all >= 2.0).astype(f32)                # [S, 1]
        num_valid = jnp.sum(valid_col, axis=0, keepdims=True)      # [1, 1]
        active = jnp.where(num_valid >= 2.0, 1.0, 0.0)             # batch gate
        denom = jnp.maximum(num_valid, 1.0)

        # pairwise center distances dist[i, j] = |c_i - c_j| via the Gram matrix
        gram = lax.dot_general(centers, centers, _DN_RT,
                               preferred_element_type=f32)         # [S, S]
        sq_col = jnp.sum(centers * centers, axis=1, keepdims=True) # [S, 1]
        z_col = centers[:, 2:3]                                    # [S, 1]

        # row-oriented ([1,S]) copies of sq / z / valid via a tiny identity
        # matmul (no in-kernel transpose, no second N-contraction matmul).
        cidx = lax.broadcasted_iota(jnp.int32, (S, 3), 1)
        cols3 = jnp.where(cidx == 0, sq_col,
                          jnp.where(cidx == 1, z_col, valid_col))  # [S, 3]
        eye3 = (lax.broadcasted_iota(jnp.int32, (3, 3), 0) ==
                lax.broadcasted_iota(jnp.int32, (3, 3), 1)).astype(f32)
        rows3 = lax.dot_general(eye3, cols3, _DN_RT,
                                preferred_element_type=f32)        # [3, S]
        sq_row = rows3[0:1, :]
        z_row = rows3[1:2, :]
        valid_row = rows3[2:3, :]

        dist = jnp.sqrt(jnp.maximum(sq_col + sq_row - 2.0 * gram, 0.0))  # [S,S]

        # 4 relation statistics (superpoint i on sublanes, reduce over j lanes).
        # Reference semantics: stats over valid superpoints, self-distance kept.
        w = valid_row                                               # [1, S]
        mean_col = jnp.sum(dist * w, axis=1, keepdims=True) / denom        # [S,1]
        min_col = jnp.min(jnp.where(w > 0.0, dist, 1e9),
                          axis=1, keepdims=True)                            # [S,1]
        frac_col = jnp.sum(jnp.where(z_col > z_row, 1.0, 0.0) * w,
                           axis=1, keepdims=True) / denom                   # [S,1]

        # stack [mean, min, z, frac] -> [S, 4] with selects (no concatenate),
        # and zero invalid rows BEFORE the MLP (the 1e9 sentinel never enters it).
        fidx = lax.broadcasted_iota(jnp.int32, (S, 4), 1)
        rel = jnp.where(fidx == 0, mean_col,
              jnp.where(fidx == 1, min_col,
              jnp.where(fidx == 2, z_col, frac_col)))               # [S, 4]
        row_mask = valid_col * active                                # [S, 1]
        rel = rel * row_mask

        # relation_mlp: Linear(4, D/4) -> GELU -> Linear(D/4, D)
        h = jnp.dot(rel, w1_ref[...], preferred_element_type=f32) + b1_ref[...]
        h = _gelu(h)
        enc = jnp.dot(h, w2_ref[...], preferred_element_type=f32) + b2_ref[...]

        # relation_aggregator: Linear -> LayerNorm -> GELU -> Linear
        a = jnp.dot(enc, w3_ref[...], preferred_element_type=f32) + b3_ref[...]
        mu = jnp.mean(a, axis=1, keepdims=True)
        ms = jnp.mean(a * a, axis=1, keepdims=True)
        var = jnp.maximum(ms - mu * mu, 0.0)          # one-pass LayerNorm stats
        a = (a - mu) * lax.rsqrt(var + 1e-5)
        a = a * g_ref[...] + be_ref[...]
        a = _gelu(a)
        sp_feat = jnp.dot(a, w4_ref[...], preferred_element_type=f32) + b4_ref[...]
        sp_feat = sp_feat * row_mask                                 # [S, D]

        if transpose_out:
            # emit [D, S] so pass 2 can use a plain (non-transposed) matmul
            D = sp_feat.shape[1]
            eye_d = (lax.broadcasted_iota(jnp.int32, (D, D), 0) ==
                     lax.broadcasted_iota(jnp.int32, (D, D), 1)).astype(f32)
            sp_out = lax.dot_general(eye_d, sp_feat, _DN_RT,
                                     preferred_element_type=f32)     # [D, S]
        else:
            sp_out = sp_feat                                         # [S, D]
        out_ref[0] = sp_out.astype(out_ref.dtype)


# --------------------------------------------------------------------------- #
# Pass 2: broadcast superpoint features back to their points (per N tile)
# --------------------------------------------------------------------------- #
def _scatter_kernel(labels_ref, sp_ref, out_ref, *, s_max, n_on_lanes):
    bf16 = jnp.bfloat16
    f32 = jnp.float32
    if n_on_lanes:
        labels = labels_ref[0]                                       # [1, NT]
        NT = labels.shape[1]
        sp_ids = lax.broadcasted_iota(jnp.int32, (s_max, NT), 0)
        onehot = (labels == sp_ids).astype(bf16)                     # [S, NT]
        sp_t = sp_ref[0].astype(bf16)                                # [D, S]
        out = jnp.dot(sp_t, onehot, preferred_element_type=f32)      # [D, NT]
    else:
        labels = labels_ref[0]                                       # [NT, 1]
        NT = labels.shape[0]
        sp_ids = lax.broadcasted_iota(jnp.int32, (NT, s_max), 1)
        onehot_t = (labels == sp_ids).astype(bf16)                   # [NT, S]
        sp = sp_ref[0].astype(bf16)                                  # [S, D]
        out = jnp.dot(onehot_t, sp, preferred_element_type=f32)      # [NT, D]
    out_ref[0] = out.astype(out_ref.dtype)


# --------------------------------------------------------------------------- #
# Wrapper
# --------------------------------------------------------------------------- #
@functools.partial(jax.jit, static_argnames=("s_max", "n_tile"))
def spatial_relationship_encoder(coordinates, features, superpoint_labels,
                                 params, *, s_max, n_tile=None):
    """coordinates [B,N,3], features [B,N,D], superpoint_labels [B,N] -> [B,N,D]."""
    B, N, D = features.shape
    if n_tile is None:
        n_tile = min(512, _round_up(N, 128))
    n_tile = _round_up(int(n_tile), 128)
    n_pad = _round_up(N, n_tile)
    num_tiles = n_pad // n_tile

    (w1, b1, w2, b2, w3, b3, gamma, beta, w4, b4) = params
    H = w1.shape[1]

    coords_t = jnp.swapaxes(coordinates.astype(jnp.float32), 1, 2)   # [B, 3, N]
    labels_i = superpoint_labels.astype(jnp.int32)                   # [B, N]
    if n_pad != N:
        coords_t = jnp.pad(coords_t, ((0, 0), (0, 0), (0, n_pad - N)))
        labels_i = jnp.pad(labels_i, ((0, 0), (0, n_pad - N)), constant_values=-1)
    labels_row = labels_i.reshape(B, 1, n_pad)

    # output layout: natural [B,N,D] (lane-dense) when D >= 128, else [B,D,N]
    n_on_lanes = D < 128

    # ---- pass 1: per-superpoint stats + relation MLP ------------------------
    sp_shape = (B, D, s_max) if n_on_lanes else (B, s_max, D)
    sp_block = (1, D, s_max) if n_on_lanes else (1, s_max, D)
    kern1 = functools.partial(_stats_mlp_kernel, s_max=s_max,
                              transpose_out=n_on_lanes)
    sp_feat = pl.pallas_call(
        kern1,
        out_shape=jax.ShapeDtypeStruct(sp_shape, jnp.float32),
        grid=(B, num_tiles),
        in_specs=[
            pl.BlockSpec((1, 3, n_tile), lambda b, t: (b, 0, t)),
            pl.BlockSpec((1, 1, n_tile), lambda b, t: (b, 0, t)),
            _pinned((4, H)), _pinned((1, H)),        # relation_mlp L1
            _pinned((H, D)), _pinned((1, D)),        # relation_mlp L2
            _pinned((D, D)), _pinned((1, D)),        # aggregator L1
            _pinned((1, D)), _pinned((1, D)),        # LayerNorm gamma / beta
            _pinned((D, D)), _pinned((1, D)),        # aggregator L2
        ],
        out_specs=pl.BlockSpec(sp_block, lambda b, t: (b, 0, 0)),
        scratch_shapes=[pltpu.VMEM((s_max, 4), jnp.float32)],
        compiler_params=pltpu.CompilerParams(
            dimension_semantics=("parallel", "arbitrary")),
    )(coords_t, labels_row, w1, b1, w2, b2, w3, b3, gamma, beta, w4, b4)

    # ---- pass 2: scatter superpoint features back to points -----------------
    kern2 = functools.partial(_scatter_kernel, s_max=s_max, n_on_lanes=n_on_lanes)
    if n_on_lanes:
        labels_arg = labels_row                                       # [B, 1, Np]
        lab_spec = pl.BlockSpec((1, 1, n_tile), lambda b, t: (b, 0, t))
        out_shape = jax.ShapeDtypeStruct((B, D, n_pad), features.dtype)
        out_spec = pl.BlockSpec((1, D, n_tile), lambda b, t: (b, 0, t))
    else:
        labels_arg = labels_i.reshape(B, n_pad, 1)                    # [B, Np, 1]
        lab_spec = pl.BlockSpec((1, n_tile, 1), lambda b, t: (b, t, 0))
        out_shape = jax.ShapeDtypeStruct((B, n_pad, D), features.dtype)
        out_spec = pl.BlockSpec((1, n_tile, D), lambda b, t: (b, t, 0))

    out = pl.pallas_call(
        kern2,
        out_shape=out_shape,
        grid=(B, num_tiles),
        in_specs=[lab_spec, pl.BlockSpec(sp_block, lambda b, t: (b, 0, 0))],
        out_specs=out_spec,
        compiler_params=pltpu.CompilerParams(
            dimension_semantics=("parallel", "parallel")),
    )(labels_arg, sp_feat)

    if n_on_lanes:
        out = jnp.swapaxes(out, 1, 2)                                 # [B, Np, D]
    return out[:, :N, :]


# --------------------------------------------------------------------------- #
# Parameter init (PyTorch-style uniform +-1/sqrt(fan_in)) and pure-JAX reference
# --------------------------------------------------------------------------- #
def init_params(key, fusion_dim):
    H = fusion_dim // 4
    ks = jax.random.split(key, 8)

    def lin(kw, kb, fan_in, fan_out):
        bound = 1.0 / float(fan_in) ** 0.5
        W = jax.random.uniform(kw, (fan_in, fan_out), jnp.float32, -bound, bound)
        b = jax.random.uniform(kb, (1, fan_out), jnp.float32, -bound, bound)
        return W, b

    w1, b1 = lin(ks[0], ks[1], 4, H)
    w2, b2 = lin(ks[2], ks[3], H, fusion_dim)
    w3, b3 = lin(ks[4], ks[5], fusion_dim, fusion_dim)
    gamma = jnp.ones((1, fusion_dim), jnp.float32)
    beta = jnp.zeros((1, fusion_dim), jnp.float32)
    w4, b4 = lin(ks[6], ks[7], fusion_dim, fusion_dim)
    return (w1, b1, w2, b2, w3, b3, gamma, beta, w4, b4)


def _gelu_exact(x):
    return 0.5 * x * (1.0 + lax.erf(x * 0.7071067811865475))


def reference_forward(coordinates, superpoint_labels, params, s_max):
    """Faithful (eager, loopy) re-implementation of the PyTorch module."""
    (w1, b1, w2, b2, w3, b3, gamma, beta, w4, b4) = params
    B, N, _ = coordinates.shape
    D = w4.shape[1]
    out = jnp.zeros((B, N, D), jnp.float32)
    for b in range(B):
        coords = coordinates[b]
        labels = superpoint_labels[b]
        centers, masks = [], []
        for sp in range(s_max):
            m = labels == sp
            cnt = int(jnp.sum(m))
            if cnt < 2:
                continue
            centers.append(jnp.sum(jnp.where(m[:, None], coords, 0.0), axis=0) / cnt)
            masks.append(m)
        if len(centers) < 2:
            continue
        C = jnp.stack(centers)
        d = jnp.sqrt(jnp.sum((C[:, None, :] - C[None, :, :]) ** 2, axis=-1))
        for i, m in enumerate(masks):
            od = d[i]
            rel = jnp.stack([jnp.mean(od), jnp.min(od), C[i, 2],
                             jnp.mean((C[i, 2] > C[:, 2]).astype(jnp.float32))])[None, :]
            h = _gelu_exact(rel @ w1 + b1)
            enc = h @ w2 + b2
            a = enc @ w3 + b3
            mu = jnp.mean(a, axis=-1, keepdims=True)
            var = jnp.mean((a - mu) ** 2, axis=-1, keepdims=True)
            a = (a - mu) / jnp.sqrt(var + 1e-5) * gamma + beta
            a = _gelu_exact(a)
            feat = (a @ w4 + b4)[0]
            out = out.at[b].set(jnp.where(m[:, None], feat[None, :], out[b]))
    return out


if __name__ == "__main__":
    B, N, D = 2, 256, 32      # batch, points, fusion_dim
    S_MAX = 8                 # maximum superpoint id + 1 (labels in [-1, S_MAX))

    key = jax.random.PRNGKey(0)
    k_coord, k_label, k_feat, k_param = jax.random.split(key, 4)

    coordinates = jax.random.normal(k_coord, (B, N, 3), jnp.float32)
    superpoint_labels = jax.random.randint(k_label, (B, N), -1, S_MAX, jnp.int32)
    features = jax.random.normal(k_feat, (B, N, D), jnp.float32)
    params = init_params(k_param, D)

    # n_tile=128 -> two point tiles per batch element: exercises the
    # accumulate/finalize pipeline and the tiled scatter grid.
    out = spatial_relationship_encoder(coordinates, features, superpoint_labels,
                                       params, s_max=S_MAX, n_tile=128)
    out = jax.block_until_ready(out)

    assert out.shape == (B, N, D) and out.dtype == features.dtype
    assert bool(jnp.all(jnp.isfinite(out)))

    ref = reference_forward(coordinates, superpoint_labels, params, S_MAX)
    err = float(jnp.max(jnp.abs(out.astype(jnp.float32) - ref)))
    # tolerance covers the bf16 scatter matmul and the tanh-GELU approximation
    assert err < 8e-2, f"max abs err vs reference = {err}"

    print("KERNEL_OK")
</pallas_src>

<mosaic_0001>
module attributes {stable_mosaic.version = 11 : i64} {
  func.func @_scatter_kernel(%arg0: i32, %arg1: i32, %arg2: memref<1x1x128xi32, #tpu.memory_space<vmem>>, %arg3: memref<1x32x8xf32, #tpu.memory_space<vmem>>, %arg4: memref<1x32x128xf32, #tpu.memory_space<vmem>>) attributes {dimension_semantics = [#tpu.dimension_semantics<parallel>, #tpu.dimension_semantics<parallel>], iteration_bounds = array<i64: 2, 2>, scalar_prefetch = 0 : i64, scratch_operands = 0 : i64, tpu.core_type = #tpu.core_type<tc>, window_params = [{transform_indices = @transform_0, window_bounds = array<i64: 1, 1, 128>}, {transform_indices = @transform_1, window_bounds = array<i64: 1, 32, 8>}, {transform_indices = @transform_2, window_bounds = array<i64: 1, 32, 128>}]} {
    %c0 = arith.constant 0 : index
    %c0_0 = arith.constant 0 : index
    %c0_1 = arith.constant 0 : index
    %0 = vector.load %arg2[%c0, %c0_0, %c0_1] : memref<1x1x128xi32, #tpu.memory_space<vmem>>, vector<1x1x128xi32>
    %1 = vector.shape_cast %0 : vector<1x1x128xi32> to vector<1x128xi32>
    %2 = tpu.iota {dimensions = array<i32: 0>} : vector<8x128xi32>
    %3 = vector.broadcast %1 : vector<1x128xi32> to vector<8x128xi32>
    %4 = arith.cmpi eq, %3, %2 : vector<8x128xi32>
    %5 = arith.extui %4 : vector<8x128xi1> to vector<8x128xi32>
    %6 = arith.sitofp %5 : vector<8x128xi32> to vector<8x128xf32>
    %7 = arith.truncf %6 : vector<8x128xf32> to vector<8x128xbf16>
    %c0_2 = arith.constant 0 : index
    %c0_3 = arith.constant 0 : index
    %c0_4 = arith.constant 0 : index
    %8 = vector.load %arg3[%c0_2, %c0_3, %c0_4] : memref<1x32x8xf32, #tpu.memory_space<vmem>>, vector<1x32x8xf32>
    %9 = vector.shape_cast %8 : vector<1x32x8xf32> to vector<32x8xf32>
    %10 = arith.truncf %9 : vector<32x8xf32> to vector<32x8xbf16>
    %cst = arith.constant dense<0.000000e+00> : vector<32x128xf32>
    %11 = tpu.matmul %10, %7, %cst {dimension_numbers = #tpu.dot_dimension_numbers<[1], [0], [0], [1], [0, 0, 1, 1], [], []>} : vector<32x8xbf16>, vector<8x128xbf16>, vector<32x128xf32> -> vector<32x128xf32>
    %c0_5 = arith.constant 0 : index
    %c0_6 = arith.constant 0 : index
    %c0_7 = arith.constant 0 : index
    %12 = vector.load %arg4[%c0_5, %c0_6, %c0_7] : memref<1x32x128xf32, #tpu.memory_space<vmem>>, vector<1x32x128xf32>
    %13 = vector.shape_cast %12 : vector<1x32x128xf32> to vector<32x128xf32>
    %14 = vector.shape_cast %11 : vector<32x128xf32> to vector<1x32x128xf32>
    tpu.vector_store %arg4[%c0_5, %c0_6, %c0_7], %14 {strides = array<i32>} : memref<1x32x128xf32, #tpu.memory_space<vmem>>, vector<1x32x128xf32>,
    return
  }
  func.func @transform_0(%arg0: i32, %arg1: i32) -> (i32, i32, i32) {
    %c0_i32 = arith.constant 0 : i32
    %c0_i32_0 = arith.constant 0 : i32
    return %arg0, %c0_i32, %arg1 : i32, i32, i32
  }
  func.func @transform_1(%arg0: i32, %arg1: i32) -> (i32, i32, i32) {
    %c0_i32 = arith.constant 0 : i32
    %c0_i32_0 = arith.constant 0 : i32
    %c0_i32_1 = arith.constant 0 : i32
    return %arg0, %c0_i32, %c0_i32_0 : i32, i32, i32
  }
  func.func @transform_2(%arg0: i32, %arg1: i32) -> (i32, i32, i32) {
    %c0_i32 = arith.constant 0 : i32
    %c0_i32_0 = arith.constant 0 : i32
    return %arg0, %c0_i32, %arg1 : i32, i32, i32
  }
}

module attributes {stable_mosaic.version = 11 : i64} {
  func.func @_stats_mlp_kernel(%arg0: i32, %arg1: i32, %arg2: memref<1x3x128xf32, #tpu.memory_space<vmem>>, %arg3: memref<1x1x128xi32, #tpu.memory_space<vmem>>, %arg4: memref<4x8xf32, #tpu.memory_space<vmem>>, %arg5: memref<1x8xf32, #tpu.memory_space<vmem>>, %arg6: memref<8x32xf32, #tpu.memory_space<vmem>>, %arg7: memref<1x32xf32, #tpu.memory_space<vmem>>, %arg8: memref<32x32xf32, #tpu.memory_space<vmem>>, %arg9: memref<1x32xf32, #tpu.memory_space<vmem>>, %arg10: memref<1x32xf32, #tpu.memory_space<vmem>>, %arg11: memref<1x32xf32, #tpu.memory_space<vmem>>, %arg12: memref<32x32xf32, #tpu.memory_space<vmem>>, %arg13: memref<1x32xf32, #tpu.memory_space<vmem>>, %arg14: memref<1x32x8xf32, #tpu.memory_space<vmem>>, %arg15: memref<8x4xf32, #tpu.memory_space<vmem>>) attributes {dimension_semantics = [#tpu.dimension_semantics<parallel>, #tpu.dimension_semantics<arbitrary>], iteration_bounds = array<i64: 2, 2>, scalar_prefetch = 0 : i64, scratch_operands = 1 : i64, tpu.core_type = #tpu.core_type<tc>, window_params = [{transform_indices = @transform_0, window_bounds = array<i64: 1, 3, 128>}, {transform_indices = @transform_1, window_bounds = array<i64: 1, 1, 128>}, {pipeline_mode = #tpu.pipeline_mode<synchronous>, transform_indices = @transform_2, window_bounds = array<i64: 4, 8>}, {pipeline_mode = #tpu.pipeline_mode<synchronous>, transform_indices = @transform_3, window_bounds = array<i64: 1, 8>}, {pipeline_mode = #tpu.pipeline_mode<synchronous>, transform_indices = @transform_4, window_bounds = array<i64: 8, 32>}, {pipeline_mode = #tpu.pipeline_mode<synchronous>, transform_indices = @transform_5, window_bounds = array<i64: 1, 32>}, {pipeline_mode = #tpu.pipeline_mode<synchronous>, transform_indices = @transform_6, window_bounds = array<i64: 32, 32>}, {pipeline_mode = #tpu.pipeline_mode<synchronous>, transform_indices = @transform_7, window_bounds = array<i64: 1, 32>}, {pipeline_mode = #tpu.pipeline_mode<synchronous>, transform_indices = @transform_8, window_bounds = array<i64: 1, 32>}, {pipeline_mode = #tpu.pipeline_mode<synchronous>, transform_indices = @transform_9, window_bounds = array<i64: 1, 32>}, {pipeline_mode = #tpu.pipeline_mode<synchronous>, transform_indices = @transform_10, window_bounds = array<i64: 32, 32>}, {pipeline_mode = #tpu.pipeline_mode<synchronous>, transform_indices = @transform_11, window_bounds = array<i64: 1, 32>}, {transform_indices = @transform_12, window_bounds = array<i64: 1, 32, 8>}]} {
    %c0_i32 = arith.constant 0 : i32
    %0 = arith.cmpi eq, %arg1, %c0_i32 : i32
    %1 = arith.extui %0 : i1 to i32
    %c0_i32_0 = arith.constant 0 : i32
    %2 = arith.cmpi ne, %1, %c0_i32_0 : i32
    scf.if %2 {
      %cst_15 = arith.constant 0.000000e+00 : f32
      %24 = vector.broadcast %cst_15 : f32 to vector<8x4xf32>
      %c0_16 = arith.constant 0 : index
      %c0_17 = arith.constant 0 : index
      %25 = vector.load %arg15[%c0_16, %c0_17] : memref<8x4xf32, #tpu.memory_space<vmem>>, vector<8x4xf32>
      tpu.vector_store %arg15[%c0_16, %c0_17], %24 {strides = array<i32>} : memref<8x4xf32, #tpu.memory_space<vmem>>, vector<8x4xf32>,
    } else {
    }
    %c0 = arith.constant 0 : index
    %c0_1 = arith.constant 0 : index
    %c0_2 = arith.constant 0 : index
    %3 = vector.load %arg2[%c0, %c0_1, %c0_2] : memref<1x3x128xf32, #tpu.memory_space<vmem>>, vector<1x3x128xf32>
    %4 = vector.shape_cast %3 : vector<1x3x128xf32> to vector<3x128xf32>
    %c0_3 = arith.constant 0 : index
    %c0_4 = arith.constant 0 : index
    %c0_5 = arith.constant 0 : index
    %5 = vector.load %arg3[%c0_3, %c0_4, %c0_5] : memref<1x1x128xi32, #tpu.memory_space<vmem>>, vector<1x1x128xi32>
    %6 = vector.shape_cast %5 : vector<1x1x128xi32> to vector<1x128xi32>
    %7 = tpu.iota {dimensions = array<i32: 0>} : vector<8x128xi32>
    %8 = vector.broadcast %6 : vector<1x128xi32> to vector<8x128xi32>
    %9 = arith.cmpi eq, %8, %7 : vector<8x128xi32>
    %10 = arith.extui %9 : vector<8x128xi1> to vector<8x128xi32>
    %11 = arith.sitofp %10 : vector<8x128xi32> to vector<8x128xf32>
    %cst = arith.constant dense<0.000000e+00> : vector<8x3xf32>
    %12 = tpu.matmul %11, %4, %cst {dimension_numbers = #tpu.dot_dimension_numbers<[1], [1], [0], [0], [0, 0, 1, 0], [], []>} : vector<8x128xf32>, vector<3x128xf32>, vector<8x3xf32> -> vector<8x3xf32>
    %cst_6 = arith.constant dense<0.000000e+00> : vector<8xf32>
    %13 = vector.multi_reduction <add>, %11, %cst_6 [1] : vector<8x128xf32> to vector<8xf32>
    %14 = vector.shape_cast %13 : vector<8xf32> to vector<8x1xf32>
    %c0_7 = arith.constant 0 : index
    %c0_8 = arith.constant 0 : index
    %15 = vector.load %arg15[%c0_7, %c0_8] : memref<8x4xf32, #tpu.memory_space<vmem>>, vector<8x3xf32>
    %16 = arith.addf %15, %12 : vector<8x3xf32>
    %c0_9 = arith.constant 0 : index
    %c0_10 = arith.constant 0 : index
    %17 = vector.load %arg15[%c0_9, %c0_10] : memref<8x4xf32, #tpu.memory_space<vmem>>, vector<8x3xf32>
    tpu.vector_store %arg15[%c0_9, %c0_10], %16 {strides = array<i32>} : memref<8x4xf32, #tpu.memory_space<vmem>>, vector<8x3xf32>,
    %c0_11 = arith.constant 0 : index
    %c3 = arith.constant 3 : index
    %18 = vector.load %arg15[%c0_11, %c3] : memref<8x4xf32, #tpu.memory_space<vmem>>, vector<8x1xf32>
    %19 = arith.addf %18, %14 : vector<8x1xf32>
    %c0_12 = arith.constant 0 : index
    %c3_13 = arith.constant 3 : index
    %20 = vector.load %arg15[%c0_12, %c3_13] : memref<8x4xf32, #tpu.memory_space<vmem>>, vector<8x1xf32>
    tpu.vector_store %arg15[%c0_12, %c3_13], %19 {strides = array<i32>} : memref<8x4xf32, #tpu.memory_space<vmem>>, vector<8x1xf32>,
    %c1_i32 = arith.constant 1 : i32
    %21 = arith.cmpi eq, %arg1, %c1_i32 : i32
    %22 = arith.extui %21 : i1 to i32
    %c0_i32_14 = arith.constant 0 : i32
    %23 = arith.cmpi ne, %22, %c0_i32_14 : i32
    scf.if %23 {
      %c0_15 = arith.constant 0 : index
      %c0_16 = arith.constant 0 : index
      %24 = vector.load %arg15[%c0_15, %c0_16] : memref<8x4xf32, #tpu.memory_space<vmem>>, vector<8x3xf32>
      %c0_17 = arith.constant 0 : index
      %c3_18 = arith.constant 3 : index
      %25 = vector.load %arg15[%c0_17, %c3_18] : memref<8x4xf32, #tpu.memory_space<vmem>>, vector<8x1xf32>
      %cst_19 = arith.constant 1.000000e+00 : f32
      %26 = vector.broadcast %cst_19 : f32 to vector<8x1xf32>
      %27 = arith.maximumf %25, %26 : vector<8x1xf32>
      %28 = vector.broadcast %27 : vector<8x1xf32> to vector<8x3xf32>
      %29 = arith.divf %24, %28 : vector<8x3xf32>
      %cst_20 = arith.constant 2.000000e+00 : f32
      %30 = vector.broadcast %cst_20 : f32 to vector<8x1xf32>
      %31 = arith.cmpf oge, %25, %30 : vector<8x1xf32>
      %32 = arith.extui %31 : vector<8x1xi1> to vector<8x1xi32>
      %33 = arith.sitofp %32 : vector<8x1xi32> to vector<8x1xf32>
      %cst_21 = arith.constant dense<0.000000e+00> : vector<1xf32>
      %34 = vector.multi_reduction <add>, %33, %cst_21 [0] : vector<8x1xf32> to vector<1xf32>
      %35 = vector.shape_cast %34 : vector<1xf32> to vector<1x1xf32>
      %cst_22 = arith.constant 2.000000e+00 : f32
      %36 = vector.broadcast %cst_22 : f32 to vector<1x1xf32>
      %37 = arith.cmpf oge, %35, %36 : vector<1x1xf32>
      %cst_23 = arith.constant 1.000000e+00 : f32
      %cst_24 = arith.constant 0.000000e+00 : f32
      %38 = vector.broadcast %cst_23 : f32 to vector<1x1xf32>
      %39 = vector.broadcast %cst_24 : f32 to vector<1x1xf32>
      %40 = arith.select %37, %38, %39 : vector<1x1xi1>, vector<1x1xf32>
      %cst_25 = arith.constant 1.000000e+00 : f32
      %41 = vector.broadcast %cst_25 : f32 to vector<1x1xf32>
      %42 = arith.maximumf %35, %41 : vector<1x1xf32>
      %cst_26 = arith.constant dense<0.000000e+00> : vector<8x8xf32>
      %43 = tpu.matmul %29, %29, %cst_26 {dimension_numbers = #tpu.dot_dimension_numbers<[1], [1], [0], [0], [0, 0, 1, 0], [], []>} : vector<8x3xf32>, vector<8x3xf32>, vector<8x8xf32> -> vector<8x8xf32>
      %44 = arith.mulf %29, %29 : vector<8x3xf32>
      %cst_27 = arith.constant dense<0.000000e+00> : vector<8xf32>
      %45 = vector.multi_reduction <add>, %44, %cst_27 [1] : vector<8x3xf32> to vector<8xf32>
      %46 = vector.shape_cast %45 : vector<8xf32> to vector<8x1xf32>
      %47 = vector.extract_strided_slice %29 {offsets = [0, 2], sizes = [8, 1], strides = [1, 1]} : vector<8x3xf32> to vector<8x1xf32>
      %48 = tpu.iota {dimensions = array<i32: 1>} : vector<8x3xi32>
      %c0_i32_28 = arith.constant 0 : i32
      %49 = vector.broadcast %c0_i32_28 : i32 to vector<8x3xi32>
      %50 = arith.cmpi eq, %48, %49 : vector<8x3xi32>
      %c1_i32_29 = arith.constant 1 : i32
      %51 = vector.broadcast %c1_i32_29 : i32 to vector<8x3xi32>
      %52 = arith.cmpi eq, %48, %51 : vector<8x3xi32>
      %53 = vector.shape_cast %47 : vector<8x1xf32> to vector<8x1xf32>
      %54 = vector.broadcast %53 : vector<8x1xf32> to vector<8x3xf32>
      %55 = vector.shape_cast %33 : vector<8x1xf32> to vector<8x1xf32>
      %56 = vector.broadcast %55 : vector<8x1xf32> to vector<8x3xf32>
      %57 = arith.select %52, %54, %56 : vector<8x3xi1>, vector<8x3xf32>
      %58 = vector.shape_cast %46 : vector<8x1xf32> to vector<8x1xf32>
      %59 = vector.broadcast %58 : vector<8x1xf32> to vector<8x3xf32>
      %60 = arith.select %50, %59, %57 : vector<8x3xi1>, vector<8x3xf32>
      %61 = tpu.iota {dimensions = array<i32: 0>} : vector<3x3xi32>
      %62 = tpu.iota {dimensions = array<i32: 1>} : vector<3x3xi32>
      %63 = arith.cmpi eq, %61, %62 : vector<3x3xi32>
      %64 = arith.extui %63 : vector<3x3xi1> to vector<3x3xi32>
      %65 = arith.sitofp %64 : vector<3x3xi32> to vector<3x3xf32>
      %cst_30 = arith.constant dense<0.000000e+00> : vector<3x8xf32>
      %66 = tpu.matmul %65, %60, %cst_30 {dimension_numbers = #tpu.dot_dimension_numbers<[1], [1], [0], [0], [0, 0, 1, 0], [], []>} : vector<3x3xf32>, vector<8x3xf32>, vector<3x8xf32> -> vector<3x8xf32>
      %67 = vector.extract_strided_slice %66 {offsets = [0, 0], sizes = [1, 8], strides = [1, 1]} : vector<3x8xf32> to vector<1x8xf32>
      %68 = vector.extract_strided_slice %66 {offsets = [1, 0], sizes = [1, 8], strides = [1, 1]} : vector<3x8xf32> to vector<1x8xf32>
      %69 = vector.extract_strided_slice %66 {offsets = [2, 0], sizes = [1, 8], strides = [1, 1]} : vector<3x8xf32> to vector<1x8xf32>
      %70 = vector.broadcast %46 : vector<8x1xf32> to vector<8x8xf32>
      %71 = vector.broadcast %67 : vector<1x8xf32> to vector<8x8xf32>
      %72 = arith.addf %70, %71 : vector<8x8xf32>
      %cst_31 = arith.constant 2.000000e+00 : f32
      %73 = vector.broadcast %cst_31 : f32 to vector<8x8xf32>
      %74 = arith.mulf %73, %43 : vector<8x8xf32>
      %75 = arith.subf %72, %74 : vector<8x8xf32>
      %cst_32 = arith.constant 0.000000e+00 : f32
      %76 = vector.broadcast %cst_32 : f32 to vector<8x8xf32>
      %77 = arith.maximumf %75, %76 : vector<8x8xf32>
      %78 = math.sqrt %77 : vector<8x8xf32>
      %79 = vector.broadcast %69 : vector<1x8xf32> to vector<8x8xf32>
      %80 = arith.mulf %78, %79 : vector<8x8xf32>
      %cst_33 = arith.constant dense<0.000000e+00> : vector<8xf32>
      %81 = vector.multi_reduction <add>, %80, %cst_33 [1] : vector<8x8xf32> to vector<8xf32>
      %82 = vector.shape_cast %81 : vector<8xf32> to vector<8x1xf32>
      %83 = vector.broadcast %42 : vector<1x1xf32> to vector<8x1xf32>
      %84 = arith.divf %82, %83 : vector<8x1xf32>
      %cst_34 = arith.constant 0.000000e+00 : f32
      %85 = vector.broadcast %cst_34 : f32 to vector<1x8xf32>
      %86 = arith.cmpf ogt, %69, %85 : vector<1x8xf32>
      %cst_35 = arith.constant 1.000000e+09 : f32
      %87 = vector.shape_cast %86 : vector<1x8xi1> to vector<1x8xi1>
      %88 = vector.broadcast %87 : vector<1x8xi1> to vector<8x8xi1>
      %89 = vector.broadcast %cst_35 : f32 to vector<8x8xf32>
      %90 = arith.select %88, %78, %89 : vector<8x8xi1>, vector<8x8xf32>
      %cst_36 = arith.constant dense<0x7F800000> : vector<8xf32>
      %91 = vector.multi_reduction <minimumf>, %90, %cst_36 [1] : vector<8x8xf32> to vector<8xf32>
      %92 = vector.shape_cast %91 : vector<8xf32> to vector<8x1xf32>
      %93 = vector.broadcast %47 : vector<8x1xf32> to vector<8x8xf32>
      %94 = vector.broadcast %68 : vector<1x8xf32> to vector<8x8xf32>
      %95 = arith.cmpf ogt, %93, %94 : vector<8x8xf32>
      %cst_37 = arith.constant 1.000000e+00 : f32
      %cst_38 = arith.constant 0.000000e+00 : f32
      %96 = vector.broadcast %cst_37 : f32 to vector<8x8xf32>
      %97 = vector.broadcast %cst_38 : f32 to vector<8x8xf32>
      %98 = arith.select %95, %96, %97 : vector<8x8xi1>, vector<8x8xf32>
      %99 = vector.broadcast %69 : vector<1x8xf32> to vector<8x8xf32>
      %100 = arith.mulf %98, %99 : vector<8x8xf32>
      %cst_39 = arith.constant dense<0.000000e+00> : vector<8xf32>
      %101 = vector.multi_reduction <add>, %100, %cst_39 [1] : vector<8x8xf32> to vector<8xf32>
      %102 = vector.shape_cast %101 : vector<8xf32> to vector<8x1xf32>
      %103 = vector.broadcast %42 : vector<1x1xf32> to vector<8x1xf32>
      %104 = arith.divf %102, %103 : vector<8x1xf32>
      %105 = tpu.iota {dimensions = array<i32: 1>} : vector<8x4xi32>
      %c0_i32_40 = arith.constant 0 : i32
      %106 = vector.broadcast %c0_i32_40 : i32 to vector<8x4xi32>
      %107 = arith.cmpi eq, %105, %106 : vector<8x4xi32>
      %c1_i32_41 = arith.constant 1 : i32
      %108 = vector.broadcast %c1_i32_41 : i32 to vector<8x4xi32>
      %109 = arith.cmpi eq, %105, %108 : vector<8x4xi32>
      %c2_i32 = arith.constant 2 : i32
      %110 = vector.broadcast %c2_i32 : i32 to vector<8x4xi32>
      %111 = arith.cmpi eq, %105, %110 : vector<8x4xi32>
      %112 = vector.shape_cast %47 : vector<8x1xf32> to vector<8x1xf32>
      %113 = vector.broadcast %112 : vector<8x1xf32> to vector<8x4xf32>
      %114 = vector.shape_cast %104 : vector<8x1xf32> to vector<8x1xf32>
      %115 = vector.broadcast %114 : vector<8x1xf32> to vector<8x4xf32>
      %116 = arith.select %111, %113, %115 : vector<8x4xi1>, vector<8x4xf32>
      %117 = vector.shape_cast %92 : vector<8x1xf32> to vector<8x1xf32>
      %118 = vector.broadcast %117 : vector<8x1xf32> to vector<8x4xf32>
      %119 = arith.select %109, %118, %116 : vector<8x4xi1>, vector<8x4xf32>
      %120 = vector.shape_cast %84 : vector<8x1xf32> to vector<8x1xf32>
      %121 = vector.broadcast %120 : vector<8x1xf32> to vector<8x4xf32>
      %122 = arith.select %107, %121, %119 : vector<8x4xi1>, vector<8x4xf32>
      %123 = vector.broadcast %40 : vector<1x1xf32> to vector<8x1xf32>
      %124 = arith.mulf %33, %123 : vector<8x1xf32>
      %125 = vector.broadcast %124 : vector<8x1xf32> to vector<8x4xf32>
      %126 = arith.mulf %122, %125 : vector<8x4xf32>
      %c0_42 = arith.constant 0 : index
      %c0_43 = arith.constant 0 : index
      %127 = vector.load %arg4[%c0_42, %c0_43] : memref<4x8xf32, #tpu.memory_space<vmem>>, vector<4x8xf32>
      %cst_44 = arith.constant dense<0.000000e+00> : vector<8x8xf32>
      %128 = tpu.matmul %126, %127, %cst_44 {dimension_numbers = #tpu.dot_dimension_numbers<[1], [0], [0], [1], [0, 0, 1, 1], [], []>} : vector<8x4xf32>, vector<4x8xf32>, vector<8x8xf32> -> vector<8x8xf32>
      %c0_45 = arith.constant 0 : index
      %c0_46 = arith.constant 0 : index
      %129 = vector.load %arg5[%c0_45, %c0_46] : memref<1x8xf32, #tpu.memory_space<vmem>>, vector<1x8xf32>
      %130 = vector.broadcast %129 : vector<1x8xf32> to vector<8x8xf32>
      %131 = arith.addf %128, %130 : vector<8x8xf32>
      %cst_47 = arith.constant 5.000000e-01 : f32
      %132 = vector.broadcast %cst_47 : f32 to vector<8x8xf32>
      %133 = arith.mulf %132, %131 : vector<8x8xf32>
      %cst_48 = arith.constant 4.471500e-02 : f32
      %134 = vector.broadcast %cst_48 : f32 to vector<8x8xf32>
      %135 = arith.mulf %134, %131 : vector<8x8xf32>
      %136 = arith.mulf %135, %131 : vector<8x8xf32>
      %137 = arith.mulf %136, %131 : vector<8x8xf32>
      %138 = arith.addf %131, %137 : vector<8x8xf32>
      %cst_49 = arith.constant 0.797884583 : f32
      %139 = vector.broadcast %cst_49 : f32 to vector<8x8xf32>
      %140 = arith.mulf %139, %138 : vector<8x8xf32>
      %141 = math.tanh %140 : vector<8x8xf32>
      %cst_50 = arith.constant 1.000000e+00 : f32
      %142 = vector.broadcast %cst_50 : f32 to vector<8x8xf32>
      %143 = arith.addf %142, %141 : vector<8x8xf32>
      %144 = arith.mulf %133, %143 : vector<8x8xf32>
      %c0_51 = arith.constant 0 : index
      %c0_52 = arith.constant 0 : index
      %145 = vector.load %arg6[%c0_51, %c0_52] : memref<8x32xf32, #tpu.memory_space<vmem>>, vector<8x32xf32>
      %cst_53 = arith.constant dense<0.000000e+00> : vector<8x32xf32>
      %146 = tpu.matmul %144, %145, %cst_53 {dimension_numbers = #tpu.dot_dimension_numbers<[1], [0], [0], [1], [0, 0, 1, 1], [], []>} : vector<8x8xf32>, vector<8x32xf32>, vector<8x32xf32> -> vector<8x32xf32>
      %c0_54 = arith.constant 0 : index
      %c0_55 = arith.constant 0 : index
      %147 = vector.load %arg7[%c0_54, %c0_55] : memref<1x32xf32, #tpu.memory_space<vmem>>, vector<1x32xf32>
      %148 = vector.broadcast %147 : vector<1x32xf32> to vector<8x32xf32>
      %149 = arith.addf %146, %148 : vector<8x32xf32>
      %c0_56 = arith.constant 0 : index
      %c0_57 = arith.constant 0 : index
      %150 = vector.load %arg8[%c0_56, %c0_57] : memref<32x32xf32, #tpu.memory_space<vmem>>, vector<32x32xf32>
      %cst_58 = arith.constant dense<0.000000e+00> : vector<8x32xf32>
      %151 = tpu.matmul %149, %150, %cst_58 {dimension_numbers = #tpu.dot_dimension_numbers<[1], [0], [0], [1], [0, 0, 1, 1], [], []>} : vector<8x32xf32>, vector<32x32xf32>, vector<8x32xf32> -> vector<8x32xf32>
      %c0_59 = arith.constant 0 : index
      %c0_60 = arith.constant 0 : index
      %152 = vector.load %arg9[%c0_59, %c0_60] : memref<1x32xf32, #tpu.memory_space<vmem>>, vector<1x32xf32>
      %153 = vector.broadcast %152 : vector<1x32xf32> to vector<8x32xf32>
      %154 = arith.addf %151, %153 : vector<8x32xf32>
      %cst_61 = arith.constant dense<0.000000e+00> : vector<8xf32>
      %155 = vector.multi_reduction <add>, %154, %cst_61 [1] : vector<8x32xf32> to vector<8xf32>
      %156 = vector.shape_cast %155 : vector<8xf32> to vector<8x1xf32>
      %cst_62 = arith.constant 3.200000e+01 : f32
      %157 = vector.broadcast %cst_62 : f32 to vector<8x1xf32>
      %158 = arith.divf %156, %157 : vector<8x1xf32>
      %159 = arith.mulf %154, %154 : vector<8x32xf32>
      %cst_63 = arith.constant dense<0.000000e+00> : vector<8xf32>
      %160 = vector.multi_reduction <add>, %159, %cst_63 [1] : vector<8x32xf32> to vector<8xf32>
      %161 = vector.shape_cast %160 : vector<8xf32> to vector<8x1xf32>
      %cst_64 = arith.constant 3.200000e+01 : f32
      %162 = vector.broadcast %cst_64 : f32 to vector<8x1xf32>
      %163 = arith.divf %161, %162 : vector<8x1xf32>
      %164 = arith.mulf %158, %158 : vector<8x1xf32>
      %165 = arith.subf %163, %164 : vector<8x1xf32>
      %cst_65 = arith.constant 0.000000e+00 : f32
      %166 = vector.broadcast %cst_65 : f32 to vector<8x1xf32>
      %167 = arith.maximumf %165, %166 : vector<8x1xf32>
      %168 = vector.broadcast %158 : vector<8x1xf32> to vector<8x32xf32>
      %169 = arith.subf %154, %168 : vector<8x32xf32>
      %cst_66 = arith.constant 9.99999974E-6 : f32
      %170 = vector.broadcast %cst_66 : f32 to vector<8x1xf32>
      %171 = arith.addf %167, %170 : vector<8x1xf32>
      %172 = math.rsqrt %171 : vector<8x1xf32>
      %173 = vector.broadcast %172 : vector<8x1xf32> to vector<8x32xf32>
      %174 = arith.mulf %169, %173 : vector<8x32xf32>
      %c0_67 = arith.constant 0 : index
      %c0_68 = arith.constant 0 : index
      %175 = vector.load %arg10[%c0_67, %c0_68] : memref<1x32xf32, #tpu.memory_space<vmem>>, vector<1x32xf32>
      %176 = vector.broadcast %175 : vector<1x32xf32> to vector<8x32xf32>
      %177 = arith.mulf %174, %176 : vector<8x32xf32>
      %c0_69 = arith.constant 0 : index
      %c0_70 = arith.constant 0 : index
      %178 = vector.load %arg11[%c0_69, %c0_70] : memref<1x32xf32, #tpu.memory_space<vmem>>, vector<1x32xf32>
      %179 = vector.broadcast %178 : vector<1x32xf32> to vector<8x32xf32>
      %180 = arith.addf %177, %179 : vector<8x32xf32>
      %cst_71 = arith.constant 5.000000e-01 : f32
      %181 = vector.broadcast %cst_71 : f32 to vector<8x32xf32>
      %182 = arith.mulf %181, %180 : vector<8x32xf32>
      %cst_72 = arith.constant 4.471500e-02 : f32
      %183 = vector.broadcast %cst_72 : f32 to vector<8x32xf32>
      %184 = arith.mulf %183, %180 : vector<8x32xf32>
      %185 = arith.mulf %184, %180 : vector<8x32xf32>
      %186 = arith.mulf %185, %180 : vector<8x32xf32>
      %187 = arith.addf %180, %186 : vector<8x32xf32>
      %cst_73 = arith.constant 0.797884583 : f32
      %188 = vector.broadcast %cst_73 : f32 to vector<8x32xf32>
      %189 = arith.mulf %188, %187 : vector<8x32xf32>
      %190 = math.tanh %189 : vector<8x32xf32>
      %cst_74 = arith.constant 1.000000e+00 : f32
      %191 = vector.broadcast %cst_74 : f32 to vector<8x32xf32>
      %192 = arith.addf %191, %190 : vector<8x32xf32>
      %193 = arith.mulf %182, %192 : vector<8x32xf32>
      %c0_75 = arith.constant 0 : index
      %c0_76 = arith.constant 0 : index
      %194 = vector.load %arg12[%c0_75, %c0_76] : memref<32x32xf32, #tpu.memory_space<vmem>>, vector<32x32xf32>
      %cst_77 = arith.constant dense<0.000000e+00> : vector<8x32xf32>
      %195 = tpu.matmul %193, %194, %cst_77 {dimension_numbers = #tpu.dot_dimension_numbers<[1], [0], [0], [1], [0, 0, 1, 1], [], []>} : vector<8x32xf32>, vector<32x32xf32>, vector<8x32xf32> -> vector<8x32xf32>
      %c0_78 = arith.constant 0 : index
      %c0_79 = arith.constant 0 : index
      %196 = vector.load %arg13[%c0_78, %c0_79] : memref<1x32xf32, #tpu.memory_space<vmem>>, vector<1x32xf32>
      %197 = vector.broadcast %196 : vector<1x32xf32> to vector<8x32xf32>
      %198 = arith.addf %195, %197 : vector<8x32xf32>
      %199 = vector.broadcast %124 : vector<8x1xf32> to vector<8x32xf32>
      %200 = arith.mulf %198, %199 : vector<8x32xf32>
      %201 = tpu.iota {dimensions = array<i32: 0>} : vector<32x32xi32>
      %202 = tpu.iota {dimensions = array<i32: 1>} : vector<32x32xi32>
      %203 = arith.cmpi eq, %201, %202 : vector<32x32xi32>
      %204 = arith.extui %203 : vector<32x32xi1> to vector<32x32xi32>
      %205 = arith.sitofp %204 : vector<32x32xi32> to vector<32x32xf32>
      %cst_80 = arith.constant dense<0.000000e+00> : vector<32x8xf32>
      %206 = tpu.matmul %205, %200, %cst_80 {dimension_numbers = #tpu.dot_dimension_numbers<[1], [1], [0], [0], [0, 0, 1, 0], [], []>} : vector<32x32xf32>, vector<8x32xf32>, vector<32x8xf32> -> vector<32x8xf32>
      %c0_81 = arith.constant 0 : index
      %c0_82 = arith.constant 0 : index
      %c0_83 = arith.constant 0 : index
      %207 = vector.load %arg14[%c0_81, %c0_82, %c0_83] : memref<1x32x8xf32, #tpu.memory_space<vmem>>, vector<1x32x8xf32>
      %208 = vector.shape_cast %207 : vector<1x32x8xf32> to vector<32x8xf32>
      %209 = vector.shape_cast %206 : vector<32x8xf32> to vector<1x32x8xf32>
      tpu.vector_store %arg14[%c0_81, %c0_82, %c0_83], %209 {strides = array<i32>} : memref<1x32x8xf32, #tpu.memory_space<vmem>>, vector<1x32x8xf32>,
    } else {
    }
    return
  }
  func.func @transform_0(%arg0: i32, %arg1: i32) -> (i32, i32, i32) {
    %c0_i32 = arith.constant 0 : i32
    %c0_i32_0 = arith.constant 0 : i32
    return %arg0, %c0_i32, %arg1 : i32, i32, i32
  }
  func.func @transform_1(%arg0: i32, %arg1: i32) -> (i32, i32, i32) {
    %c0_i32 = arith.constant 0 : i32
    %c0_i32_0 = arith.constant 0 : i32
    return %arg0, %c0_i32, %arg1 : i32, i32, i32
  }
  func.func @transform_2(%arg0: i32, %arg1: i32) -> (i32, i32) {
    %c0_i32 = arith.constant 0 : i32
    %c0_i32_0 = arith.constant 0 : i32
    %c0_i32_1 = arith.constant 0 : i32
    return %c0_i32, %c0_i32_0 : i32, i32
  }
  func.func @transform_3(%arg0: i32, %arg1: i32) -> (i32, i32) {
    %c0_i32 = arith.constant 0 : i32
    %c0_i32_0 = arith.constant 0 : i32
    %c0_i32_1 = arith.constant 0 : i32
    return %c0_i32, %c0_i32_0 : i32, i32
  }
  func.func @transform_4(%arg0: i32, %arg1: i32) -> (i32, i32) {
    %c0_i32 = arith.constant 0 : i32
    %c0_i32_0 = arith.constant 0 : i32
    %c0_i32_1 = arith.constant 0 : i32
    return %c0_i32, %c0_i32_0 : i32, i32
  }
  func.func @transform_5(%arg0: i32, %arg1: i32) -> (i32, i32) {
    %c0_i32 = arith.constant 0 : i32
    %c0_i32_0 = arith.constant 0 : i32
    %c0_i32_1 = arith.constant 0 : i32
    return %c0_i32, %c0_i32_0 : i32, i32
  }
  func.func @transform_6(%arg0: i32, %arg1: i32) -> (i32, i32) {
    %c0_i32 = arith.constant 0 : i32
    %c0_i32_0 = arith.constant 0 : i32
    %c0_i32_1 = arith.constant 0 : i32
    return %c0_i32, %c0_i32_0 : i32, i32
  }
  func.func @transform_7(%arg0: i32, %arg1: i32) -> (i32, i32) {
    %c0_i32 = arith.constant 0 : i32
    %c0_i32_0 = arith.constant 0 : i32
    %c0_i32_1 = arith.constant 0 : i32
    return %c0_i32, %c0_i32_0 : i32, i32
  }
  func.func @transform_8(%arg0: i32, %arg1: i32) -> (i32, i32) {
    %c0_i32 = arith.constant 0 : i32
    %c0_i32_0 = arith.constant 0 : i32
    %c0_i32_1 = arith.constant 0 : i32
    return %c0_i32, %c0_i32_0 : i32, i32
  }
  func.func @transform_9(%arg0: i32, %arg1: i32) -> (i32, i32) {
    %c0_i32 = arith.constant 0 : i32
    %c0_i32_0 = arith.constant 0 : i32
    %c0_i32_1 = arith.constant 0 : i32
    return %c0_i32, %c0_i32_0 : i32, i32
  }
  func.func @transform_10(%arg0: i32, %arg1: i32) -> (i32, i32) {
    %c0_i32 = arith.constant 0 : i32
    %c0_i32_0 = arith.constant 0 : i32
    %c0_i32_1 = arith.constant 0 : i32
    return %c0_i32, %c0_i32_0 : i32, i32
  }
  func.func @transform_11(%arg0: i32, %arg1: i32) -> (i32, i32) {
    %c0_i32 = arith.constant 0 : i32
    %c0_i32_0 = arith.constant 0 : i32
    %c0_i32_1 = arith.constant 0 : i32
    return %c0_i32, %c0_i32_0 : i32, i32
  }
  func.func @transform_12(%arg0: i32, %arg1: i32) -> (i32, i32, i32) {
    %c0_i32 = arith.constant 0 : i32
    %c0_i32_0 = arith.constant 0 : i32
    %c0_i32_1 = arith.constant 0 : i32
    return %arg0, %c0_i32, %c0_i32_0 : i32, i32, i32
  }
}

</mosaic_0001>

<bundles_post_ra>
// kernel: spatial_relationship_encoder.3
= control target key start
LH: loop header
LB: loop body
LE: loop exit
PB: predicated region body
PF: predicated region fallthrough
CT: control target
= control target key end

     0   :  { %7 = vsyncpa [#allocation3], 0  ;;  %s675_s0 = inlined_call_operand.vmem [shape: s32[2,1,256], index: 0, kind: input, shape index: {}]   ;;  %s676_s1 = inlined_call_operand.vmem [shape: f32[2,32,8], index: 1, kind: input, shape index: {}]   ;;  %s677_s2 = inlined_call_operand.hbm [shape: f32[2,32,256], index: 2, kind: output, shape index: {}]  }
   0x1   :  { %9 = vsyncpa [#allocation3 + $0x1], 0  ;;  %s550_s9 = smov 0   ;;  %s552_s10 = smov 0  }
   0x2   :  { %s554_s11 = smov 0   ;;  %s556_s12 = smov 0  }
   0x3   :  { %s558_s13 = smov 0   ;;  %s560_s14 = smov 0  }
   0x4   :  { %s562_s15 = smov 0   ;;  %s564_s16 = smov 0  }
   0x5 LB: > { %s340_s17 = sadd.s32 4294967295, %s529_s16   ;;  %s341_s18 = sadd.s32 4294967294, %s529_s16   ;;  %s529_s16 = sphi %s564_s16, %s15_s16   ;;  %s525_s15 = sphi %s562_s15, %s686_s15   ;;  %s521_s14 = sphi %s560_s14, %s685_s14   ;;  %s517_s13 = sphi %s558_s13, %s684_s13   ;;  %s513_s12 = sphi %s556_s12, %s683_s12   ;;  %s509_s11 = sphi %s554_s11, %s682_s11   ;;  %s505_s10 = sphi %s552_s10, %s681_s10   ;;  %s501_s9 = sphi %s550_s9, %s680_s9  }
   0x6   : > { %s24_s19 = sadd.s32 1, %s521_s14  ;;  %s27_s20 = sadd.s32 1, %s525_s15 }
   0x7   : > { %p25_p0 = scmp.ge.s32.totalorder %s24_s19, 2  ;;  %p100_p1 = scmp.ne.s32.totalorder %s509_s11, %s505_s10 }
   0x8   : > { %p101_p2 = scmp.eq.s32.totalorder %s340_s17, 3  ;;  %p106_p5 = scmp.ne.s32.totalorder %s505_s10, %s501_s9 }
   0x9   : > { %s688_s19 = smov (%p25_p0, %s24_s19), 0  ;;  %s690_s20 = smov (!%p25_p0, %s27_s20), %s525_s15 }
   0xa   : > { %s86_s21 = ssub.s32 %s521_s14, %s688_s19  ;;  %p601_p3 = por %p101_p2, %p100_p1 }
   0xb   : > { %p29_p4 = scmp.ge.s32.totalorder %s690_s20, 2  ;;  %p107_p6 = scmp.eq.s32.totalorder %s341_s18, 3 }
   0xc   : > { %p344_p7 = scmp.ge.s32.totalorder %s529_s16, 1  ;;  %p143_p9 = scmp.lt.s32.totalorder %s529_s16, 5 }
   0xd   : > { %s692_s20 = smov (%p29_p4, %s690_s20), 0  ;;  %p610_p8 = por %p107_p6, %p106_p5 }
   0xe   : > { %s85_s24 = ssub.s32 %s525_s15, %s692_s20  ;;  %s90_s25 = sadd.s32 1, %s509_s11 }
   0xf   : > { %s87_s26 = sor.u32 %s86_s21, %s85_s24  ;;  %p144_p10 = pnand %p344_p7, %p143_p9 }
  0x10   : > { %p88_p11 = scmp.eq.s32.totalorder %s87_s26, 0  ;;  %p172_p12 = scmp.lt.s32.totalorder (!%p144_p10), %s517_s13, 1 }
  0x11   : > { %147 = sbr.rel (%p144_p10) target bundleno = 176 (0xb0), region = 28  ;;  %p174_p13 = scmp.lt.s32.totalorder (!%p144_p10), %s513_s12, 1 }
  0x12   : > { %s619_s27 = scalar_select %p88_p11, %s509_s11, %s90_s25  }
  0x13   : > { %s169_s21 = sand.u32 (!%p144_p10), 1, %s505_s10   ;;  %s353_s24 = sshll.u32 (!%p144_p10), %s517_s13, 3 }
  0x14   : > { %s345_s25 = sshll.u32 (!%p144_p10), %s169_s21, 5  ;;  %s244_s26 = sadd.s32 (!%p144_p10), %s513_s12, %s353_s24 }
  0x16   : > { %v186_v0 = vlaneseq  ;;  %s173_s28 = scalar_select %p172_p12, %s517_s13, 1  ;;  %v531_v4 = vmov 0.0   ;;  %vm206_vm1 = vcmask 1043456   ;;  %vm199_vm2 = vcmask 64512  }
  0x17   : > { %s175_s29 = scalar_select %p174_p13, %s513_s12, 1 }
  0x18   : > { %s346_s30 = sshll.u32 %s173_s28, 1  ;;  %s357_s3 = sshll.u32 %s173_s28, 5  ;;  %v187_v1 = vshrl.u32 %v186_v0, 7 }
  0x19   : > { %s177_s4 = sadd.s32 %s346_s30, %s175_s29  ;;  %s183_s18 = scalar_lea.vmem %s676_s1, %s357_s3 }
  0x1a   : > { %s178_s7 = scalar_lea.vmem %s675_s0, %s177_s4  ;;  %v193_v3 = vld [vmem:[%s183_s18] sm:$0xff]  ;;  %v194_v6 = vld [vmem:[%s183_s18 + $0x8] sm:$0xff]  ;;  %v195_v7 = vld [vmem:[%s183_s18 + $0x10] sm:$0xff]  ;;  %s354_s28 = sshll.u32 %s244_s26, 3 }
  0x1b   : > { %v434_v2 = vld [vmem:[%s178_s7] ss:$0 sm:$0xff]  ;;  %v196_v8 = vld [vmem:[%s183_s18 + $0x18] sm:$0xff]  ;;  %v197_v11 = vpack.c.bf16 %v194_v6, %v193_v3  ;;  %s171_s29 = scalar_lea.vmem [#allocation2], %s345_s25  ;;  %s246_s4 = scalar_lea.hbm %s677_s2, %s354_s28 }
  0x1c   : > { %vm189_vm0 = vcmp.eq.s32.totalorder %v434_v2, %v187_v1  ;;  %v198_v12 = vpack.c.bf16 %v196_v8, %v195_v7  ;;  %s247_s5 = sshll.u32 %s171_s29, 4  ;;  %s249_s6 = sshll.u32 %s246_s4, 4  ;;  %s248_s5 = int_to_ptr.vmem [resolvable:$true] %s247_s5  ;;  %s250_s6 = int_to_ptr.hbm [resolvable:$true] %s249_s6 }
  0x1d   : > { %v349_v5 = vsel %vm189_vm0, 1.0, %v531_v4  ;;  %s234_s12 = scalar_lea.sflag [#allocation3], %s169_s21  ;;  %s449_s13 = sshra.s32 %s250_s6, 4  ;;  %s450_s13 = int_to_ptr.hbm [resolvable:$true] %s449_s13 }
  0x1e   : > { %v192_v9 = vpack.c.bf16 %v349_v5, %v349_v5  ;;  %s451_s7 = scalar_lea.hbm %s450_s13, 32  ;;  %s455_s18 = scalar_lea.hbm %s677_s2, 128 }
  0x1f   : > { %p452_p0 = scmp.ne.s32.totalorder %s450_s13, %s451_s7  ;;  %p456_p4 = scmp.lt.s32.totalorder %s450_s13, %s677_s2 }
  0x20   : > { %v208_v10 = vsel %vm206_vm1, %v192_v9, 0  ;;  %p457_p5 = scmp.lt.s32.totalorder %s455_s18, %s451_s7 }
  0x21   : > { %217 = vmatpush.bf16.msra.mxu0 %v208_v10  ;;  %358 = vmatpush.bf16.msra.mxu1 %v208_v10  ;;  %p453_p1 = pnand %p452_p0, %p601_p3 }
  0x22   : > { %p458_p6 = por %p457_p5, %p456_p4 }
  0x23   : > { %p454_p2 = pneg %p453_p1 }
  0x24   : > { %350 = vmatmul.msk.bf16.vlgmr.msra.gmra.mxu0 %vm199_vm2, %v197_v11  ;;  %351 = vmatmul.msk.bf16.vlgmr.msra.gmra.mxu1 %vm199_vm2, %v198_v12 }
  0x25   : > { %p459_p7 = pnand %p458_p6, %p454_p2 }
  0xa1   : > { %v219_v13 = vpop.f32.mrf.mxu0  ;;  %v224_v14 = vpop.f32.mrf.mxu1 }
  0xa2   : > { %229 = vst [vmem:[%s171_s29] sm:$0xff] %v219_v13 }
  0xa3   : > { %231 = vst [vmem:[%s171_s29 + $0x10] sm:$0xff] %v224_v14 }
  0xa9   : > { %v221_v15 = vpop.f32.mrf.mxu0  ;;  %v226_v16 = vpop.f32.mrf.mxu1 }
  0xaa   : > { %230 = vst [vmem:[%s171_s29 + $0x8] sm:$0xff] %v221_v15 }
  0xab   : > { %232 = vst [vmem:[%s171_s29 + $0x18] sm:$0xff] %v226_v16 }
  0xac   : > { %462 = shalt.err (!%p459_p7)
}
  0xad   : > { %s532_s21 = smov 128   ;;  %s533_s26 = smov 256  }
  0xae   : > { %s534_s28 = smov 8  }
  0xaf   : > { %359 = dma.vmem_to_hbm [thread:$0]  (%p601_p3), %s248_s5, 512, %s250_s6, %s234_s12, %s532_s21, %s533_s26, %s534_s28  }
  0xb0 PF: > { %p365_p9 = scmp.ge.s32.totalorder %s529_s16, 2  ;;  %s264_s29 = sand.u32 1, %s501_s9  }
  0xb1   : > { %s265_s30 = scalar_lea.sflag [#allocation3], %s264_s29 }
  0xb2   : > { %p362_p10 = pnand %p365_p9, %p610_p8 }
  0xb4   : > { %p363_p11 = pneg %p362_p10 }
  0xb6   : > { %496 = dma.done.wait (%p363_p11), %s265_s30, 512  }
  0xb7   : > { %498 = vsyncadd (%p363_p11), %s265_s30, 4294966784  ;;  %s15_s16 = sadd.s32 1, %s529_s16   ;;  %s680_s9 = smov %s505_s10 }
  0xb8   : > { %p12_p12 = scmp.ge.s32.totalorder %s15_s16, 6   ;;  %s681_s10 = smov %s509_s11 }
  0xb9   : > { %s682_s11 = smov %s619_s27  ;;  %s683_s12 = smov %s521_s14 }
  0xba   : > { %s684_s13 = smov %s525_s15  ;;  %s685_s14 = smov %s688_s19 }
  0xbb   : > { %s686_s15 = smov %s692_s20  ;;  %14 = sbr.rel (!%p12_p12) target bundleno = 5 (0x5), region = 66 }
  0xc0   :  { %271 = vsyncpa [#allocation3], 1 }
  0xc1   :  { %273 = vsyncpa [#allocation3 + $0x1], 1 }

// kernel: spatial_relationship_encoder.2
= control target key start
LH: loop header
LB: loop body
LE: loop exit
PB: predicated region body
PF: predicated region fallthrough
CT: control target
= control target key end

     0   :  { %s1689_s0 = inlined_call_operand.vmem [shape: f32[2,3,256], index: 0, kind: input, shape index: {}]   ;;  %s1690_s1 = inlined_call_operand.vmem [shape: s32[2,1,256], index: 1, kind: input, shape index: {}]   ;;  %s1691_s2 = inlined_call_operand.hbm [shape: f32[4,8], index: 2, kind: input, shape index: {}]   ;;  %s1692_s3 = inlined_call_operand.vmem [shape: f32[1,8], index: 3, kind: input, shape index: {}]   ;;  %s1693_s4 = inlined_call_operand.vmem [shape: f32[8,32], index: 4, kind: input, shape index: {}]   ;;  %s1694_s5 = inlined_call_operand.hbm [shape: f32[1,32], index: 5, kind: input, shape index: {}]   ;;  %s1695_s6 = inlined_call_operand.vmem [shape: f32[32,32], index: 6, kind: input, shape index: {}]   ;;  %s1696_s7 = inlined_call_operand.vmem [shape: f32[1,32], index: 7, kind: input, shape index: {}]   ;;  %s1697_s8 = inlined_call_operand.vmem [shape: f32[1,32], index: 8, kind: input, shape index: {}]   ;;  %s1698_s9 = inlined_call_operand.vmem [shape: f32[1,32], index: 9, kind: input, shape index: {}]   ;;  %s1699_s10 = inlined_call_operand.hbm [shape: f32[32,32], index: 10, kind: input, shape index: {}]   ;;  %s1700_s11 = inlined_call_operand.vmem [shape: f32[1,32], index: 11, kind: input, shape index: {}]   ;;  %s1701_s12 = inlined_call_operand.vmem [shape: f32[2,32,8], index: 12, kind: output, shape index: {}]  }
   0x1   :  { %1703 = sst [smem:[#allocation11_spill]] %s1691_s2 }
   0x2   :  { %1704 = sst [smem:[#allocation12_spill]] %s1694_s5 }
   0x3   :  { %17 = vsyncpa [#allocation4], 0 }
   0x4   :  { %18 = vsyncpa [#allocation6], 0  ;;  %s1470_s21 = smov 0   ;;  %s1472_s22 = smov 0  }
   0x5   :  { %s1474_s23 = smov 0   ;;  %s1476_s24 = smov 0  }
   0x6   :  { %s1478_s25 = smov 0  }
   0x7 LB: > { %1705 = sst [smem:[#allocation10_spill]] %s1390_s25  ;;  %s1103_s29 = sadd.s32 4294967295, %s1390_s25   ;;  %s1390_s25 = sphi %s1478_s25, %s24_s25   ;;  %s1386_s24 = sphi %s1476_s24, %s1715_s24   ;;  %s1382_s23 = sphi %s1474_s23, %s1714_s23   ;;  %s1378_s22 = sphi %s1472_s22, %s1713_s22   ;;  %s1374_s21 = sphi %s1470_s21, %s1712_s21  }
   0x8   : > { %s1706_s5 = sld [smem:[#allocation12_spill]]  ;;  %p1105_p0 = scmp.ge.s32.totalorder %s1390_s25, 1 }
   0x9   : > { %p333_p1 = scmp.lt.s32.totalorder %s1390_s25, 5  ;;  %p1501_p2 = scmp.eq.s32.totalorder %s1103_s29, 0 }
   0xa   : > { %s1392_s14 = smov [#allocation5]   ;;  %s33_s17 = sadd.s32 1, %s1382_s23 }
   0xb   : > { %p1505_p3 = pnand %p1105_p0, %p333_p1  ;;  %s365_s15 = sshll.u32 %s1392_s14, 4  ;;  %s366_s15 = int_to_ptr.vmem [resolvable:$true] %s365_s15 }
   0xc   : > { %s36_s18 = sadd.s32 1, %s1386_s24  ;;  %p34_p6 = scmp.ge.s32.totalorder %s33_s17, 2 }
   0xd   : > { %p1160_p4 = pneg %p1505_p3  ;;  %s1710_s2 = sld [smem:[#allocation11_spill]] }
   0xe   : > { %s363_s28 = sshll.u32 %s1706_s5, 4  ;;  %s1717_s17 = smov (%p34_p6, %s33_s17), 0  ;;  %s364_s28 = int_to_ptr.hbm [resolvable:$true] %s363_s28 }
   0xf   : > { %p1513_p5 = pnand %p1501_p2, %p1160_p4  ;;  %s1719_s18 = smov (!%p34_p6, %s36_s18), %s1386_s24 }
  0x10   : > { %s1393_s27 = smov [#allocation3]   ;;  %s386_s25 = sshll.u32 %s1699_s10, 4  ;;  %s387_s25 = int_to_ptr.hbm [resolvable:$true] %s386_s25 }
  0x11   : > { %1166 = dma.hbm_to_vmem [thread:$0]  (!%p1513_p5), %s364_s28, 16, %s366_s15, [#allocation6]  }
  0x12   : > { %s347_s29 = sshll.u32 %s1393_s27, 4  ;;  %p38_p7 = scmp.ge.s32.totalorder %s1719_s18, 2  ;;  %s348_s29 = int_to_ptr.vmem [resolvable:$true] %s347_s29 }
  0x13   : > { %s345_s26 = sshll.u32 %s1710_s2, 4  ;;  %s1394_s28 = smov [#allocation7]   ;;  %s346_s26 = int_to_ptr.hbm [resolvable:$true] %s345_s26 }
  0x14   : > { %1163 = dma.hbm_to_vmem [thread:$0]  (!%p1513_p5), %s346_s26, 64, %s348_s29, [#allocation4]  }
  0x15   : > { %s1721_s18 = smov (%p38_p7, %s1719_s18), 0  ;;  %s388_s15 = sshll.u32 %s1394_s28, 4  ;;  %s389_s15 = int_to_ptr.vmem [resolvable:$true] %s388_s15 }
  0x16   : > { %s1395_s19 = smov 128   ;;  %s1396_s20 = smov 8  }
  0x17   : > { %1169 = dma.hbm_to_vmem [thread:$0]  (!%p1513_p5), %s387_s25, 512, %s389_s15, [#allocation6], %s1395_s19, %s1395_s19, %s1396_s20  }
  0x18   : > { %428 = sbr.rel (%p1505_p3) target bundleno = 1708 (0x6ac), region = 68 }
  0x1d   : > { %1365 = dma.done.wait (%p1501_p2), [#allocation4], 64  }
  0x1e   : > { %1367 = vsyncadd (%p1501_p2), [#allocation4], 4294967232 }
  0x1f   : > { %1369 = dma.done.wait (%p1501_p2), [#allocation6], 528  }
  0x20   : > { %1371 = vsyncadd (%p1501_p2), [#allocation6], 4294966768  ;;  %p491_p8 = scmp.lt.s32.totalorder %s1378_s22, 1  ;;  %p493_p9 = scmp.lt.s32.totalorder %s1374_s21, 1 }
  0x21   : > { %p1119_p10 = scmp.ne.s32.totalorder %s1374_s21, 0 }
  0x22   : > { %s1723_s22 = smov (!%p491_p8, %s1378_s22), 1 }
  0x23   : > { %s494_s5 = scalar_select %p493_p9, %s1374_s21, 1 }
  0x24   : > { %s1114_s25 = sshll.u32 %s1723_s22, 1  ;;  %s1144_s13 = sshll.u32 %s1723_s22, 5 }
  0x25   : > { %s496_s16 = sadd.s32 %s1114_s25, %s494_s5  ;;  %s1553_s29 = scalar_lea.vmem %s1701_s12, %s1144_s13 }
  0x26   : > { %s1115_s14 = sshll.u32 %s496_s16, 2  ;;  %s505_s15 = scalar_lea.vmem %s1690_s1, %s496_s16 }
  0x27   : > { %s498_s2 = scalar_lea.vmem %s1689_s0, %s1115_s14  ;;  %514 = sbr.rel (%p1119_p10) target bundleno = 46 (0x2e), region = 84 }
  0x2c   : > { %vm515_vm0 = vcmask 31744   ;;  %v1397_v0 = vmov 0.0  }
  0x2d   : > { %516 = vst.msk [vmem:[#allocation2] sm:$0xff] %vm515_vm0, %v1397_v0 }
  0x2e PF: > { %v517_v1 = vld [vmem:[%s498_s2] sm:$0x7]  ;;  %v519_v2 = vlaneseq  ;;  %v1398_v5 = vmov 1.0   ;;  %v1399_v6 = vmov 0.0   ;;  %vm549_vm2 = vcmask 23552   ;;  %p1122_p11 = scmp.ne.s32.totalorder %s1374_s21, 1 }
  0x2f   : > { %v1229_v3 = vld [vmem:[%s505_s15] ss:$0 sm:$0xff]  ;;  %540 = vmatpush.xpose.msra.mxu0 %v517_v1  ;;  %vm553_vm3 = vcmask 31768  }
  0x30   : > { %v1562_v4 = vshrl.u32 %v519_v2, 7 }
  0x32   : > { %vm522_vm1 = vcmp.eq.s32.totalorder %v1229_v3, %v1562_v4 }
  0x33   : > { %1121 = vmatmul.msk.f32.vlgmr.msra.gmra.mxu0 %vm522_vm1, %v1398_v5  ;;  %v1120_v7 = vsel %vm522_vm1, 1.0, %v1399_v6 }
  0x34   : > { %545 = vadd.xlane.f32.xlu0 %v1120_v7  ;;  %v547_v8 = vld [vmem:[#allocation2] sm:$0xff] }
  0xa7   : > { %v546_v11 = vpop.xlane.xlu0 %545 }
  0xb0   : > { %v542_v9 = vpop.f32.mrf.mxu0 }
  0xb1   : > { %v548_v10 = vadd.f32 %v547_v8, %v542_v9 }
  0xb3   : > { %550 = vst.msk [vmem:[#allocation2] sm:$0xff] %vm549_vm2, %v548_v10 }
  0xb9   : > { %558 = sbr.rel (%p1122_p11) target bundleno = 1708 (0x6ac), region = 88 }
  0xba   : > { %v551_v12 = vld [vmem:[#allocation2] sm:$0xff] }
  0xbb   : > { %v552_v13 = vadd.f32 %v551_v12, %v546_v11 }
  0xbd   : > { %554 = vst.msk [vmem:[#allocation2] sm:$0xff] %vm553_vm3, %v552_v13 }
  0xbe   : > { %v1400_v15 = vmov 3   ;;  %v1401_v17 = vmov 2   ;;  %v1402_v32 = vmov 0.0   ;;  %v1577_v35 = vand.u32 127, %v519_v2 }
  0xbf   : > { %1230 = vset.pattern.permute.xlu0 %v1400_v15  ;;  %1233 = vset.pattern.permute.xlu2 %v1400_v15  ;;  %vm684_vm13 = vcmask 64512   ;;  %v1403_v58 = vmov 0  }
  0xc0   : > { %1231 = vset.pattern.permute.xlu1 %v1401_v17  ;;  %vm624_vm9 = vcmp.eq.s32.totalorder %v1577_v35, 1  ;;  %vm623_vm10 = vcmp.eq.s32.totalorder %v1577_v35, 0  ;;  %vm636_vm11 = vcmp.eq.s32.totalorder %v1562_v4, %v1577_v35 }
  0xc1   : > { %v1590_v40 = vsel %vm636_vm11, 1.0, %v1402_v32  ;;  %vm745_vm11 = vcmask 31744  }
  0xc4   : > { %v559_v14 = vld [vmem:[#allocation2] sm:$0xff] }
  0xc5   : > { %v560_v16 = vmax.f32 %v559_v14, 1.0  ;;  %vm581_vm8 = vcmp.ge.f32.partialorder %v559_v14, 2.0 }
  0xc6   : > { %v1572_v33 = vsel %vm581_vm8, 1.0, %v1402_v32  ;;  %vm719_vm8 = vcmp.eq.s32.totalorder %v1577_v35, 2 }
  0xc7   : > { %563 = vperm.xlu0 %1230, %v560_v16   ;;  %v584_v7 = vsel %vm553_vm3, %v1572_v33, 0.0 }
  0xc8   : > { %v585_v8 = vrot.slane %v584_v7, 4 }
  0xca   : > { %v586_v9 = vadd.f32 %v585_v8, %v584_v7 }
  0xcc   : > { %v587_v10 = vrot.slane %v586_v9, 2 }
  0xce   : > { %v588_v11 = vadd.f32 %v587_v10, %v586_v9 }
  0xd0   : > { %v589_v12 = vrot.slane %v588_v11, 1 }
  0xd2   : > { %v590_v13 = vadd.f32 %v589_v12, %v588_v11 }
 0x139   : > { %v564_v18 = vpop.permute.xlu0 %563 }
 0x13a   : > { %1240 = vrcp.f32 %v564_v18  ;;  %v577_v22 = vand.u32 2147483648, %v564_v18  ;;  %v575_v24 = vand.u32 2147483647, %v564_v18  ;;  %vm571_vm5 = vweird.f32 %v564_v18 }
 0x13c   : > { %v578_v26 = vor.u32 1.1754944e-38, %v577_v22  ;;  %vm576_vm7 = vcmp.eq.f32.partialorder %v575_v24, 8.507059e+37 }
 0x140   : > { %v1241_v19 = vpop.eup %1240 }
 0x141   : > { %v567_v20 = vmul.f32 %v1241_v19, %v564_v18  ;;  %vm572_vm4 = vweird.f32 %v1241_v19 }
 0x142   : > { %vm573_vm6 = vmor %vm571_vm5, %vm572_vm4 }
 0x143   : > { %v568_v21 = vsub.f32 1.0, %v567_v20 }
 0x145   : > { %v569_v23 = vmul.f32 %v1241_v19, %v568_v21 }
 0x147   : > { %v570_v25 = vadd.f32 %v1241_v19, %v569_v23 }
 0x149   : > { %v574_v27 = vsel %vm573_vm6, %v1241_v19, %v570_v25  ;;  %vm591_vm6 = vcmp.ge.f32.partialorder %v590_v13, 2.0 }
 0x14a   : > { %v579_v28 = vsel %vm576_vm7, %v578_v26, %v574_v27  ;;  %vm749_vm7 = vcmask 1043456  }
 0x14b   : > { %v580_v29 = vmul.f32 %v579_v28, %v559_v14  ;;  %v593_v14 = vmax.f32 %v590_v13, 1.0 }
 0x14d   : > { %626 = vperm.xlu1 %1231, %v580_v29   ;;  %1124 = vmatpush.xpose.msk.msra.mxu0 %vm549_vm2, %v580_v29  ;;  %v617_v30 = vmul.f32 %v580_v29, %v580_v29  ;;  %v699_v19 = vand.u32 2147483648, %v593_v14  ;;  %v697_v21 = vand.u32 2147483647, %v593_v14 }
 0x14f   : > { %v618_v31 = vsel %vm549_vm2, %v617_v30, 0.0  ;;  %v700_v22 = vor.u32 1.1754944e-38, %v699_v19  ;;  %vm698_vm3 = vcmp.eq.f32.partialorder %v697_v21, 8.507059e+37 }
 0x150   : > { %619 = vadd.xlane.f32.xlu0 %v618_v31  ;;  %1125 = vmatmul.msk.f32.vlgmr.msra.gmra.mxu0 %vm549_vm2, %v580_v29  ;;  %v592_v29 = vsel %vm591_vm6, 1.0, %v1402_v32  ;;  %v740_v31 = vld [vmem:[#allocation3] sm:$0xf] }
 0x151   : > { %v733_v30 = vmul.f32 %v1572_v33, %v592_v29  ;;  %1129 = vmatpush.msk.msra.mxu2 %vm749_vm7, %v740_v31 }
 0x155   : > { %1232 = vset.pattern.permute.xlu1 %v1400_v15 }
 0x156   : > { %631 = vperm.xlu1 %1232, %v1572_v33  }
 0x1bf   : > { %v1575_v34 = vpop.permute.xlu1 %626 }
 0x1c3   : > { %v620_v37 = vpop.xlane.xlu0 %619 }
 0x1c8   : > { %v632_v36 = vpop.permute.xlu1 %631 }
 0x1c9   : > { %v634_v38 = vsel %vm624_vm9, %v1575_v34, %v632_v36 }
 0x1ca   : > { %v635_v39 = vsel %vm623_vm10, %v620_v37, %v634_v38 }
 0x1cb   : > { %1127 = vmatpush.xpose.msk.msra.mxu1 %vm549_vm2, %v635_v39 }
 0x1cd   : > { %v614_v41 = vpop.f32.mrf.mxu0 }
 0x1ce   : > { %1128 = vmatmul.msk.f32.vlgmr.msra.gmra.mxu1 %vm549_vm2, %v1590_v40  ;;  %v667_v45 = vmul.f32 2.0, %v614_v41  ;;  %vm693_vm2 = vweird.f32 %v593_v14 }
 0x24b   : > { %v662_v42 = vpop.f32.mrf.mxu1 }
 0x24c   : > { %v665_v43 = vperm.slane %v662_v42, 0  ;;  %v711_v44 = vperm.slane %v662_v42, 1  ;;  %v682_v47 = vperm.slane %v662_v42, 2  ;;  %vm703_vm14 = vcmp.gt.f32.partialorder %v662_v42, 0.0 }
 0x24d   : > { %v704_v59 = vsel %vm703_vm14, 1, %v1403_v58  ;;  %v811_v58 = vld [vmem:[%s1695_s6 + $0x8] sm:$0xff] }
 0x24e   : > { %v666_v46 = vadd.f32 %v665_v43, %v620_v37  ;;  %vm712_vm12 = vcmp.gt.f32.partialorder %v1575_v34, %v711_v44  ;;  %v705_v61 = vperm.slane %v704_v59, 2  ;;  %v782_v44 = vld [vmem:[%s1693_s4] sm:$0xff] }
 0x24f   : > { %v713_v48 = vsel %vm712_vm12, 1.0, %v1402_v32  ;;  %805 = vmatpush.msra.mxu3 %v782_v44  ;;  %v810_v59 = vld [vmem:[%s1695_s6] sm:$0xff] }
 0x250   : > { %v668_v49 = vsub.f32 %v666_v46, %v667_v45  ;;  %v714_v50 = vmul.f32 %v713_v48, %v682_v47  ;;  %vm706_vm1 = vcmp.eq.s32.totalorder %v705_v61, 1  ;;  %v812_v45 = vld [vmem:[%s1695_s6 + $0x10] sm:$0xff]  ;;  %v1234_v46 = vld [vmem:[%s1692_s3] ss:$0 sm:$0xff] }
 0x252   : > { %v669_v51 = vmax.f32 %v668_v49, 0.0  ;;  %v715_v52 = vsel %vm684_vm13, %v714_v50, 0.0 }
 0x253   : > { %716 = vadd.xlane.f32.xlu2 %v715_v52 }
 0x254   : > { %1242 = vrsqrt.f32 %v669_v51  ;;  %vm677_vm15 = vcmp.eq.f32.partialorder %v669_v51, inf  ;;  %v680_v63 = vand.u32 2147483648, %v669_v51  ;;  %vm679_vm0 = vcmp.eq.f32.partialorder %v669_v51, 0.0 }
 0x255   : > { %1244 = vrcp.f32 %v593_v14 }
 0x25a   : > { %v1243_v53 = vpop.eup %1242 }
 0x25b   : > { %v671_v54 = vmul.f32 %v1243_v53, %v669_v51  ;;  %v1245_v15 = vpop.eup %1244 }
 0x25c   : > { %v689_v16 = vmul.f32 %v1245_v15, %v593_v14  ;;  %vm694_vm4 = vweird.f32 %v1245_v15 }
 0x25d   : > { %v672_v55 = vmul.f32 %v1243_v53, %v671_v54  ;;  %vm695_vm5 = vmor %vm693_vm2, %vm694_vm4 }
 0x25e   : > { %v690_v17 = vsub.f32 1.0, %v689_v16  ;;  %v895_v16 = vld [vmem:[#allocation7 + $0x10] sm:$0xff] }
 0x25f   : > { %v673_v56 = vmul.f32 0.5, %v672_v55 }
 0x260   : > { %v691_v18 = vmul.f32 %v1245_v15, %v690_v17 }
 0x261   : > { %v674_v57 = vsub.f32 1.5, %v673_v56 }
 0x262   : > { %v692_v20 = vadd.f32 %v1245_v15, %v691_v18 }
 0x263   : > { %v675_v60 = vmul.f32 %v1243_v53, %v674_v57 }
 0x264   : > { %v696_v23 = vsel %vm695_vm5, %v1245_v15, %v692_v20  ;;  %v896_v15 = vld [vmem:[#allocation7 + $0x18] sm:$0xff]  ;;  %v894_v20 = vld [vmem:[#allocation7 + $0x8] sm:$0xff] }
 0x265   : > { %v676_v62 = vmul.f32 %v675_v60, %v669_v51  ;;  %v701_v24 = vsel %vm698_vm3, %v700_v22, %v696_v23  ;;  %v1235_v60 = vld [vmem:[#allocation5] ss:$0 sm:$0xff]  ;;  %916 = vmatpush.msrb.mxu3 %v896_v15  ;;  %v893_v22 = vld [vmem:[#allocation7] sm:$0xff] }
 0x267   : > { %v678_v0 = vsel %vm677_vm15, %v669_v51, %v676_v62  ;;  %917 = vmatpush.msrb.mxu3 %v895_v16 }
 0x268   : > { %v681_v1 = vsel %vm679_vm0, %v680_v63, %v678_v0  ;;  %v1236_v63 = vld [vmem:[%s1696_s7] ss:$0 sm:$0xff] }
 0x269   : > { %v707_v2 = vsel %vm706_vm1, %v681_v1, 1e+09  ;;  %v683_v3 = vmul.f32 %v682_v47, %v681_v1  ;;  %918 = vmatpush.msrb.mxu3 %v894_v20 }
 0x26a   : > { %v708_v5 = vsel %vm684_vm13, %v707_v2, inf }
 0x26b   : > { %709 = vmin.xlane.f32.xlu1 %v708_v5  ;;  %v685_v6 = vsel %vm684_vm13, %v683_v3, 0.0  ;;  %919 = vmatpush.msrb.mxu3 %v893_v22 }
 0x26c   : > { %686 = vadd.xlane.f32.xlu2 %v685_v6  ;;  %v1404_v6 = vmov 32.0  }
 0x2c6   : > { %v717_v25 = vpop.xlane.xlu2 %716 }
 0x2c7   : > { %v718_v26 = vmul.f32 %v717_v25, %v701_v24 }
 0x2c9   : > { %722 = vperm.xlu2 %1233, %v718_v26  }
 0x2de   : > { %v710_v39 = vpop.xlane.xlu1 %709 }
 0x2df   : > { %v687_v27 = vpop.xlane.xlu2 %686 }
 0x2e0   : > { %v702_v28 = vmul.f32 %v701_v24, %v687_v27 }
 0x2e2   : > { %729 = vperm.xlu2 %1233, %v702_v28  }
 0x2ea   : > { %736 = vperm.xlu2 %1233, %v733_v30  }
 0x323   : > { %v723_v36 = vpop.permute.xlu2 %722 }
 0x324   : > { %v725_v38 = vsel %vm719_vm8, %v1575_v34, %v723_v36  ;;  %v813_v34 = vld [vmem:[%s1695_s6 + $0x18] sm:$0xff]  ;;  %v1237_v36 = vld [vmem:[%s1697_s8] ss:$0 sm:$0xff] }
 0x325   : > { %v726_v41 = vsel %vm624_vm9, %v710_v39, %v725_v38  ;;  %834 = vmatpush.msrb.mxu2 %v813_v34  ;;  %vm818_vm9 = vcmask 261120   ;;  %v1238_v38 = vld [vmem:[%s1698_s9] ss:$0 sm:$0xff] }
 0x327   : > { %835 = vmatpush.msrb.mxu2 %v812_v45 }
 0x329   : > { %836 = vmatpush.msrb.mxu2 %v811_v58 }
 0x32b   : > { %837 = vmatpush.msrb.mxu2 %v810_v59 }
 0x33c   : > { %v730_v37 = vpop.permute.xlu2 %729 }
 0x33d   : > { %v732_v42 = vsel %vm623_vm10, %v730_v37, %v726_v41 }
 0x344   : > { %v1609_v43 = vpop.permute.xlu2 %736 }
 0x345   : > { %v739_v33 = vmul.f32 %v1609_v43, %v732_v42 }
 0x347   : > { %1130 = vmatmul.msk.f32.vlgmr.msra.gmra.mxu2 %vm745_vm11, %v739_v33 }
 0x3ca   : > { %v770_v47 = vpop.f32.mrf.mxu2 }
 0x3cb   : > { %v771_v48 = vadd.f32 %v1234_v46, %v770_v47 }
 0x3cd   : > { %v774_v49 = vmul.f32 0.044715, %v771_v48  ;;  %v773_v55 = vmul.f32 0.5, %v771_v48 }
 0x3cf   : > { %v775_v50 = vmul.f32 %v774_v49, %v771_v48 }
 0x3d1   : > { %v776_v51 = vmul.f32 %v775_v50, %v771_v48 }
 0x3d3   : > { %v777_v52 = vadd.f32 %v776_v51, %v771_v48  ;;  %v1239_v51 = vld [vmem:[%s1700_s11] ss:$0 sm:$0xff] }
 0x3d5   : > { %v778_v53 = vmul.f32 0.7978846, %v777_v52  ;;  %v925_v52 = vadd.s32 8, %v1562_v4 }
 0x3d7   : > { %1246 = vtanh.f32 %v778_v53  ;;  %v926_v53 = vadd.s32 16, %v1562_v4  ;;  %vm928_vm0 = vcmp.eq.s32.totalorder %v925_v52, %v1577_v35 }
 0x3d8   : > { %1248 = vrcp.f32 %v1404_v6  ;;  %v1134_v58 = vsel %vm928_vm0, 1.0, %v1402_v32 }
 0x3d9   : > { %vm929_vm1 = vcmp.eq.s32.totalorder %v926_v53, %v1577_v35 }
 0x3dd   : > { %v1247_v54 = vpop.eup %1246 }
 0x3de   : > { %v780_v56 = vadd.f32 1.0, %v1247_v54  ;;  %v1249_v7 = vpop.eup %1248  ;;  %v927_v54 = vadd.s32 24, %v1562_v4  ;;  %v1135_v4 = vsel %vm929_vm1, 1.0, %v1402_v32 }
 0x3df   : > { %v846_v8 = vmul.f32 32.0, %v1249_v7  ;;  %vm850_vm10 = vweird.f32 %v1249_v7 }
 0x3e0   : > { %v781_v57 = vmul.f32 %v780_v56, %v773_v55  ;;  %vm930_vm2 = vcmp.eq.s32.totalorder %v927_v54, %v1577_v35 }
 0x3e1   : > { %v847_v9 = vsub.f32 1.0, %v846_v8 }
 0x3e2   : > { %1131 = vmatmul.msk.f32.vlgmr.msra.gmra.mxu3 %vm684_vm13, %v781_v57 }
 0x3e3   : > { %v848_v10 = vmul.f32 %v1249_v7, %v847_v9 }
 0x3e5   : > { %v849_v11 = vadd.f32 %v1249_v7, %v848_v10 }
 0x3e7   : > { %v851_v12 = vsel %vm850_vm10, %v1249_v7, %v849_v11 }
 0x465   : > { %v807_v61 = vpop.f32.mrf.mxu3 }
 0x466   : > { %v808_v62 = vadd.f32 %v1235_v60, %v807_v61 }
 0x468   : > { %1132 = vmatmul.msk.f32.vlgmr.msrb.gmra.mxu2 %vm818_vm9, %v808_v62 }
 0x4eb   : > { %v839_v0 = vpop.f32.mrf.mxu2 }
 0x4ec   : > { %v840_v1 = vadd.f32 %v1236_v63, %v839_v0 }
 0x4ee   : > { %v842_v2 = vsel %vm818_vm9, %v840_v1, 0.0  ;;  %v853_v3 = vmul.f32 %v840_v1, %v840_v1 }
 0x4ef   : > { %843 = vadd.xlane.f32.xlu0 %v842_v2 }
 0x4f0   : > { %v854_v5 = vsel %vm818_vm9, %v853_v3, 0.0 }
 0x4f1   : > { %855 = vadd.xlane.f32.xlu2 %v854_v5 }
 0x562   : > { %v844_v13 = vpop.xlane.xlu0 %843 }
 0x563   : > { %v852_v14 = vmul.f32 %v851_v12, %v844_v13 }
 0x564   : > { %v856_v17 = vpop.xlane.xlu2 %855 }
 0x565   : > { %v858_v18 = vmul.f32 %v852_v14, %v852_v14  ;;  %v857_v19 = vmul.f32 %v856_v17, %v851_v12  ;;  %v861_v31 = vsub.f32 %v840_v1, %v852_v14 }
 0x567   : > { %v859_v21 = vsub.f32 %v857_v19, %v858_v18 }
 0x569   : > { %v860_v23 = vmax.f32 %v859_v21, 0.0 }
 0x56b   : > { %v862_v24 = vadd.f32 1e-05, %v860_v23 }
 0x56d   : > { %1250 = vrsqrt.f32 %v862_v24  ;;  %vm869_vm14 = vweird.f32 %v862_v24 }
 0x573   : > { %v1251_v25 = vpop.eup %1250 }
 0x574   : > { %v864_v26 = vmul.f32 %v1251_v25, %v862_v24  ;;  %vm870_vm12 = vweird.f32 %v1251_v25 }
 0x575   : > { %vm871_vm15 = vmor %vm869_vm14, %vm870_vm12 }
 0x576   : > { %v865_v27 = vmul.f32 %v1251_v25, %v864_v26 }
 0x578   : > { %v866_v28 = vmul.f32 0.5, %v865_v27 }
 0x57a   : > { %v867_v29 = vsub.f32 1.5, %v866_v28 }
 0x57c   : > { %v868_v30 = vmul.f32 %v1251_v25, %v867_v29 }
 0x57e   : > { %v872_v37 = vsel %vm871_vm15, %v1251_v25, %v868_v30 }
 0x57f   : > { %v873_v39 = vmul.f32 %v872_v37, %v861_v31 }
 0x581   : > { %v878_v41 = vmul.f32 %v1237_v36, %v873_v39 }
 0x583   : > { %v883_v42 = vadd.f32 %v1238_v38, %v878_v41 }
 0x585   : > { %v885_v33 = vmul.f32 0.044715, %v883_v42  ;;  %v884_v48 = vmul.f32 0.5, %v883_v42 }
 0x587   : > { %v886_v44 = vmul.f32 %v885_v33, %v883_v42 }
 0x589   : > { %v887_v34 = vmul.f32 %v886_v44, %v883_v42 }
 0x58b   : > { %v888_v45 = vadd.f32 %v887_v34, %v883_v42 }
 0x58d   : > { %v889_v46 = vmul.f32 0.7978846, %v888_v45 }
 0x58f   : > { %1252 = vtanh.f32 %v889_v46 }
 0x595   : > { %v1253_v47 = vpop.eup %1252 }
 0x596   : > { %v891_v49 = vadd.f32 1.0, %v1253_v47 }
 0x598   : > { %v892_v50 = vmul.f32 %v891_v49, %v884_v48 }
 0x59a   : > { %1133 = vmatmul.msk.f32.vlgmr.msrb.gmra.mxu3 %vm818_vm9, %v892_v50 }
 0x61d   : > { %v921_v55 = vpop.f32.mrf.mxu3 }
 0x61e   : > { %v922_v56 = vadd.f32 %v1239_v51, %v921_v55 }
 0x620   : > { %v924_v57 = vmul.f32 %v922_v56, %v1609_v43  ;;  %v1136_v43 = vsel %vm930_vm2, 1.0, %v1402_v32 }
 0x622   : > { %1137 = vmatpush.xpose.msk.msrb.mxu0 %vm818_vm9, %v924_v57  ;;  %1145 = vmatpush.xpose.msk.msrb.mxu1 %vm818_vm9, %v924_v57 }
 0x623   : > { %1146 = vmatpush.xpose.msk.msra.mxu2 %vm818_vm9, %v924_v57  ;;  %1147 = vmatpush.xpose.msk.msra.mxu3 %vm818_vm9, %v924_v57 }
 0x625   : > { %1138 = vmatmul.msk.f32.vlgmr.msrb.gmra.mxu0 %vm818_vm9, %v1590_v40  ;;  %1139 = vmatmul.msk.f32.vlgmr.msrb.gmra.mxu1 %vm818_vm9, %v1134_v58 }
 0x626   : > { %1140 = vmatmul.msk.f32.vlgmr.msra.gmra.mxu2 %vm818_vm9, %v1135_v4  ;;  %1141 = vmatmul.msk.f32.vlgmr.msra.gmra.mxu3 %vm818_vm9, %v1136_v43 }
 0x6a2   : > { %v968_v35 = vpop.f32.mrf.mxu0  ;;  %v971_v59 = vpop.f32.mrf.mxu1 }
 0x6a3   : > { %980 = vst.msk [vmem:[%s1553_s29] sm:$0xff] %vm684_vm13, %v968_v35 }
 0x6a4   : > { %981 = vst.msk [vmem:[%s1553_s29 + $0x8] sm:$0xff] %vm684_vm13, %v971_v59 }
 0x6a9   : > { %v974_v60 = vpop.f32.mrf.mxu2  ;;  %v977_v61 = vpop.f32.mrf.mxu3 }
 0x6aa   : > { %982 = vst.msk [vmem:[%s1553_s29 + $0x10] sm:$0xff] %vm684_vm13, %v974_v60 }
 0x6ab   : > { %983 = vst.msk [vmem:[%s1553_s29 + $0x18] sm:$0xff] %vm684_vm13, %v977_v61 }
 0x6ac PF: > { %s1711_s13 = sld [smem:[#allocation10_spill]]  ;;  %s1712_s21 = smov %s1382_s23 }
 0x6ad   : > { %s1713_s22 = smov %s1386_s24  ;;  %s1714_s23 = smov %s1717_s17 }
 0x6ae   : > { %s1715_s24 = smov %s1721_s18 }
 0x6b2   : > { %s24_s25 = sadd.s32 1, %s1711_s13  }
 0x6b3   : > { %p21_p12 = scmp.ge.s32.totalorder %s24_s25, 6  }
 0x6b5   :  { %23 = sbr.rel (!%p21_p12) target bundleno = 7 (0x7), region = 122 }
 0x6ba   :  { %1005 = vsyncpa [#allocation4], 1 }
 0x6bb   :  { %1007 = vsyncpa [#allocation4 + $0x1], 1 }
 0x6bc   :  { %1008 = vsyncpa [#allocation6], 1 }

</bundles_post_ra>
